<compile_context>
chip_gen: v7x
topology: tpu7x:2x2x1
jax: 0.10.0
libtpu: 0.0.40
codegen_flags: <defaults>
</compile_context>

<pallas_src>
import jax
import jax.numpy as jnp
from jax import lax
from jax.experimental import pallas as pl
from jax.experimental.pallas import tpu as pltpu


# packed-parameter layout (lane-aligned segment starts)
_B1_OFF = 0          # (1, 512)
_B2_OFF = 512        # (1, 256)
_BDQ1_OFF = 768      # (1, 129)  [bq1 (128) | bd (1)]
_GAMMA_OFF = 1024    # (1, 128)
_BETA_OFF = 1152     # (1, 128)
_BQ23_OFF = 1280     # (1, 12)   [bq2 (10) | bq3 (2)]
_P_WIDTH = 1408      # = 11 * 128


def discriminator_kernel(
    x_ref,      # (B, 784) f32 flattened image
    noise_ref,  # (B, 2)   f32 standard-normal noise for c2
    w1_ref,     # (784, 512) bf16
    w2_ref,     # (512, 256) bf16
    wdq1_ref,   # (256, 129) bf16  [Q1 cols 0:128 | D col 128]
    wq23_ref,   # (128, 12)  bf16  [Q2 cols 0:10  | Q3 cols 10:12]
    p_ref,      # (1, 1408)  f32 packed per-feature params
    out_ref,    # (B, 128)   f32 lane-dense output slab
):
    B = out_ref.shape[0]

    x = x_ref[...].astype(jnp.bfloat16)
    noise = noise_ref[...]

    b1 = p_ref[:, _B1_OFF:_B1_OFF + 512]
    b2 = p_ref[:, _B2_OFF:_B2_OFF + 256]
    b_dq1 = p_ref[:, _BDQ1_OFF:_BDQ1_OFF + 129]
    gamma = p_ref[:, _GAMMA_OFF:_GAMMA_OFF + 128]
    beta = p_ref[:, _BETA_OFF:_BETA_OFF + 128]
    b_q23 = p_ref[:, _BQ23_OFF:_BQ23_OFF + 12]

    # --- self.model: Linear(784,512)+LeakyReLU(0.2)+Linear(512,256)+LeakyReLU(0.2)
    h1 = jnp.dot(x, w1_ref[...], preferred_element_type=jnp.float32) + b1
    h1 = jnp.where(h1 > 0, h1, 0.2 * h1)
    h2 = jnp.dot(h1.astype(jnp.bfloat16), w2_ref[...],
                 preferred_element_type=jnp.float32) + b2
    h2 = jnp.where(h2 > 0, h2, 0.2 * h2)

    # --- fused D / Q1 matmul on the shared h2 activation
    fused1 = jnp.dot(h2.astype(jnp.bfloat16), wdq1_ref[...],
                     preferred_element_type=jnp.float32) + b_dq1
    q1 = fused1[:, 0:128]
    d_logit = fused1[:, 128:129]

    # d = sigmoid(D(x)); divide via EUP approximate reciprocal (tiny, off critical path)
    d = pl.reciprocal(1.0 + jnp.exp(-d_logit), approx=True)

    # --- x = BatchNorm1d(F.leaky_relu(Q1(x)))  (default slope 0.01, train-mode stats)
    q1 = jnp.where(q1 > 0, q1, 0.01 * q1)
    mu = jnp.mean(q1, axis=0, keepdims=True)
    var = jnp.mean((q1 - mu) * (q1 - mu), axis=0, keepdims=True)  # biased variance
    scale = gamma * lax.rsqrt(var + 1e-5)                         # fold gamma into scale
    q1n = (q1 - mu) * scale + beta

    # --- fused Q2 / Q3 matmul on the shared normalized activation
    fused2 = jnp.dot(q1n.astype(jnp.bfloat16), wq23_ref[...],
                     preferred_element_type=jnp.float32) + b_q23
    l2 = fused2[:, 0:10]
    mean3 = fused2[:, 10:12]

    # c1 = softmax(Q2(x), dim=1)  (exact division keeps row-sums == 1)
    l2 = l2 - jnp.max(l2, axis=1, keepdims=True)
    e = jnp.exp(l2)
    c1 = e / jnp.sum(e, axis=1, keepdims=True)

    # c2 = normal(mean=Q3(x), std=0.01)
    c2 = mean3 + 0.01 * noise

    # lane-dense output slab: [d | c1 | c2 | zero pad] -> single unmasked store
    slab = jnp.concatenate(
        [d, c1, c2, jnp.zeros((B, 128 - 13), jnp.float32)], axis=1)
    out_ref[...] = slab


def discriminator_forward(img, params, noise):
    B = img.shape[0]
    x = img.reshape(B, 28 * 28)   # same semantics as torch .view (free: contiguous)

    vmem = pl.BlockSpec(memory_space=pltpu.MemorySpace.VMEM)

    out = pl.pallas_call(
        discriminator_kernel,
        out_shape=jax.ShapeDtypeStruct((B, 128), jnp.float32),
        in_specs=[vmem] * 7,
        out_specs=vmem,
        compiler_params=pltpu.CompilerParams(vmem_limit_bytes=32 * 1024 * 1024),
    )(x, noise, params["w1"], params["w2"], params["w_dq1"], params["w_q23"],
      params["p"])

    d = out[:, 0:1]
    c1 = out[:, 1:11]
    c2 = out[:, 11:13]
    return d, c1, c2


def init_params(key):
    """Deterministic synthetic parameters with PyTorch Linear shapes, stored
    transposed (in, out), fused/packed for the kernel. Weights in bf16."""
    ks = jax.random.split(key, 6)

    def lin(k, fan_in, fan_out):
        bound = 1.0 / jnp.sqrt(fan_in)
        k1, k2 = jax.random.split(k)
        w = jax.random.uniform(k1, (fan_in, fan_out), jnp.float32, -bound, bound)
        b = jax.random.uniform(k2, (1, fan_out), jnp.float32, -bound, bound)
        return w, b

    w1, b1 = lin(ks[0], 784, 512)
    w2, b2 = lin(ks[1], 512, 256)
    wd, bd = lin(ks[2], 256, 1)
    wq1, bq1 = lin(ks[3], 256, 128)
    wq2, bq2 = lin(ks[4], 128, 10)
    wq3, bq3 = lin(ks[5], 128, 2)
    gamma = jnp.ones((1, 128), jnp.float32)     # BatchNorm1d affine init
    beta = jnp.zeros((1, 128), jnp.float32)

    # fused weights (Q1 cols first so the wide slice stays lane-aligned)
    w_dq1 = jnp.concatenate([wq1, wd], axis=1)      # (256, 129)
    w_q23 = jnp.concatenate([wq2, wq3], axis=1)     # (128, 12)

    # packed per-feature parameter buffer
    p = jnp.zeros((1, _P_WIDTH), jnp.float32)
    p = p.at[:, _B1_OFF:_B1_OFF + 512].set(b1)
    p = p.at[:, _B2_OFF:_B2_OFF + 256].set(b2)
    p = p.at[:, _BDQ1_OFF:_BDQ1_OFF + 128].set(bq1)
    p = p.at[:, _BDQ1_OFF + 128:_BDQ1_OFF + 129].set(bd)
    p = p.at[:, _GAMMA_OFF:_GAMMA_OFF + 128].set(gamma)
    p = p.at[:, _BETA_OFF:_BETA_OFF + 128].set(beta)
    p = p.at[:, _BQ23_OFF:_BQ23_OFF + 10].set(bq2)
    p = p.at[:, _BQ23_OFF + 10:_BQ23_OFF + 12].set(bq3)

    return dict(
        w1=w1.astype(jnp.bfloat16),
        w2=w2.astype(jnp.bfloat16),
        w_dq1=w_dq1.astype(jnp.bfloat16),
        w_q23=w_q23.astype(jnp.bfloat16),
        p=p,
    )


if __name__ == "__main__":
    key = jax.random.PRNGKey(0)
    k_img, k_param, k_noise = jax.random.split(key, 3)

    B = 8  # small batch (>1 so BatchNorm batch statistics are well-defined)
    img = jax.random.normal(k_img, (B, 1, 28, 28), jnp.float32)  # NCHW
    params = init_params(k_param)
    # TODO(synk): torch.normal draws noise inside forward(); here it is supplied
    # as a deterministic input instead of using the in-kernel TPU PRNG.
    noise = jax.random.normal(k_noise, (B, 2), jnp.float32)

    d, c1, c2 = discriminator_forward(img, params, noise)
    jax.block_until_ready((d, c1, c2))

    assert d.shape == (B, 1) and c1.shape == (B, 10) and c2.shape == (B, 2)
    assert bool(jnp.all(jnp.isfinite(d))) and bool(jnp.all(jnp.isfinite(c1))) \
        and bool(jnp.all(jnp.isfinite(c2)))
    # sigmoid range (approx reciprocal keeps it within ~1e-4 of [0, 1])
    assert bool(jnp.all((d > 0.0) & (d < 1.0 + 1e-3)))
    # softmax rows should sum to 1
    assert jnp.allclose(jnp.sum(c1, axis=1), 1.0, atol=1e-5)
    print("KERNEL_OK")
</pallas_src>

<mosaic_0001>
module attributes {stable_mosaic.version = 11 : i64} {
  func.func @discriminator_kernel(%arg0: memref<8x784xf32, #tpu.memory_space<vmem>>, %arg1: memref<8x2xf32, #tpu.memory_space<vmem>>, %arg2: memref<784x512xbf16, #tpu.memory_space<vmem>>, %arg3: memref<512x256xbf16, #tpu.memory_space<vmem>>, %arg4: memref<256x129xbf16, #tpu.memory_space<vmem>>, %arg5: memref<128x12xbf16, #tpu.memory_space<vmem>>, %arg6: memref<1x1408xf32, #tpu.memory_space<vmem>>, %arg7: memref<8x128xf32, #tpu.memory_space<vmem>>) attributes {dimension_semantics = [], scalar_prefetch = 0 : i64, scratch_operands = 0 : i64, tpu.core_type = #tpu.core_type<tc>} {
    %c0 = arith.constant 0 : index
    %c0_0 = arith.constant 0 : index
    %0 = vector.load %arg0[%c0, %c0_0] : memref<8x784xf32, #tpu.memory_space<vmem>>, vector<8x784xf32>
    %1 = arith.truncf %0 : vector<8x784xf32> to vector<8x784xbf16>
    %c0_1 = arith.constant 0 : index
    %c0_2 = arith.constant 0 : index
    %2 = vector.load %arg1[%c0_1, %c0_2] : memref<8x2xf32, #tpu.memory_space<vmem>>, vector<8x2xf32>
    %c0_3 = arith.constant 0 : index
    %c0_4 = arith.constant 0 : index
    %3 = vector.load %arg6[%c0_3, %c0_4] : memref<1x1408xf32, #tpu.memory_space<vmem>>, vector<1x512xf32>
    %c0_5 = arith.constant 0 : index
    %c512 = arith.constant 512 : index
    %4 = vector.load %arg6[%c0_5, %c512] : memref<1x1408xf32, #tpu.memory_space<vmem>>, vector<1x256xf32>
    %c0_6 = arith.constant 0 : index
    %c768 = arith.constant 768 : index
    %5 = vector.load %arg6[%c0_6, %c768] : memref<1x1408xf32, #tpu.memory_space<vmem>>, vector<1x129xf32>
    %c0_7 = arith.constant 0 : index
    %c1024 = arith.constant 1024 : index
    %6 = vector.load %arg6[%c0_7, %c1024] : memref<1x1408xf32, #tpu.memory_space<vmem>>, vector<1x128xf32>
    %c0_8 = arith.constant 0 : index
    %c1152 = arith.constant 1152 : index
    %7 = vector.load %arg6[%c0_8, %c1152] : memref<1x1408xf32, #tpu.memory_space<vmem>>, vector<1x128xf32>
    %c0_9 = arith.constant 0 : index
    %c1280 = arith.constant 1280 : index
    %8 = vector.load %arg6[%c0_9, %c1280] : memref<1x1408xf32, #tpu.memory_space<vmem>>, vector<1x12xf32>
    %c0_10 = arith.constant 0 : index
    %c0_11 = arith.constant 0 : index
    %9 = vector.load %arg2[%c0_10, %c0_11] : memref<784x512xbf16, #tpu.memory_space<vmem>>, vector<784x512xbf16>
    %cst = arith.constant dense<0.000000e+00> : vector<8x512xf32>
    %10 = tpu.matmul %1, %9, %cst {dimension_numbers = #tpu.dot_dimension_numbers<[1], [0], [0], [1], [0, 0, 1, 1], [], []>} : vector<8x784xbf16>, vector<784x512xbf16>, vector<8x512xf32> -> vector<8x512xf32>
    %11 = vector.broadcast %3 : vector<1x512xf32> to vector<8x512xf32>
    %12 = arith.addf %10, %11 : vector<8x512xf32>
    %cst_12 = arith.constant 0.000000e+00 : f32
    %13 = vector.broadcast %cst_12 : f32 to vector<8x512xf32>
    %14 = arith.cmpf ogt, %12, %13 : vector<8x512xf32>
    %cst_13 = arith.constant 2.000000e-01 : f32
    %15 = vector.broadcast %cst_13 : f32 to vector<8x512xf32>
    %16 = arith.mulf %15, %12 : vector<8x512xf32>
    %17 = arith.select %14, %12, %16 : vector<8x512xi1>, vector<8x512xf32>
    %18 = arith.truncf %17 : vector<8x512xf32> to vector<8x512xbf16>
    %c0_14 = arith.constant 0 : index
    %c0_15 = arith.constant 0 : index
    %19 = vector.load %arg3[%c0_14, %c0_15] : memref<512x256xbf16, #tpu.memory_space<vmem>>, vector<512x256xbf16>
    %cst_16 = arith.constant dense<0.000000e+00> : vector<8x256xf32>
    %20 = tpu.matmul %18, %19, %cst_16 {dimension_numbers = #tpu.dot_dimension_numbers<[1], [0], [0], [1], [0, 0, 1, 1], [], []>} : vector<8x512xbf16>, vector<512x256xbf16>, vector<8x256xf32> -> vector<8x256xf32>
    %21 = vector.broadcast %4 : vector<1x256xf32> to vector<8x256xf32>
    %22 = arith.addf %20, %21 : vector<8x256xf32>
    %cst_17 = arith.constant 0.000000e+00 : f32
    %23 = vector.broadcast %cst_17 : f32 to vector<8x256xf32>
    %24 = arith.cmpf ogt, %22, %23 : vector<8x256xf32>
    %cst_18 = arith.constant 2.000000e-01 : f32
    %25 = vector.broadcast %cst_18 : f32 to vector<8x256xf32>
    %26 = arith.mulf %25, %22 : vector<8x256xf32>
    %27 = arith.select %24, %22, %26 : vector<8x256xi1>, vector<8x256xf32>
    %28 = arith.truncf %27 : vector<8x256xf32> to vector<8x256xbf16>
    %c0_19 = arith.constant 0 : index
    %c0_20 = arith.constant 0 : index
    %29 = vector.load %arg4[%c0_19, %c0_20] : memref<256x129xbf16, #tpu.memory_space<vmem>>, vector<256x129xbf16>
    %cst_21 = arith.constant dense<0.000000e+00> : vector<8x129xf32>
    %30 = tpu.matmul %28, %29, %cst_21 {dimension_numbers = #tpu.dot_dimension_numbers<[1], [0], [0], [1], [0, 0, 1, 1], [], []>} : vector<8x256xbf16>, vector<256x129xbf16>, vector<8x129xf32> -> vector<8x129xf32>
    %31 = vector.broadcast %5 : vector<1x129xf32> to vector<8x129xf32>
    %32 = arith.addf %30, %31 : vector<8x129xf32>
    %33 = vector.extract_strided_slice %32 {offsets = [0, 0], sizes = [8, 128], strides = [1, 1]} : vector<8x129xf32> to vector<8x128xf32>
    %34 = vector.extract_strided_slice %32 {offsets = [0, 128], sizes = [8, 1], strides = [1, 1]} : vector<8x129xf32> to vector<8x1xf32>
    %cst_22 = arith.constant 0.000000e+00 : f32
    %35 = vector.broadcast %cst_22 : f32 to vector<8x1xf32>
    %36 = arith.subf %35, %34 : vector<8x1xf32>
    %37 = math.exp %36 : vector<8x1xf32>
    %cst_23 = arith.constant 1.000000e+00 : f32
    %38 = vector.broadcast %cst_23 : f32 to vector<8x1xf32>
    %39 = arith.addf %38, %37 : vector<8x1xf32>
    %40 = tpu.reciprocal %39 {approx = true} : vector<8x1xf32> -> vector<8x1xf32>
    %cst_24 = arith.constant 0.000000e+00 : f32
    %41 = vector.broadcast %cst_24 : f32 to vector<8x128xf32>
    %42 = arith.cmpf ogt, %33, %41 : vector<8x128xf32>
    %cst_25 = arith.constant 0.00999999977 : f32
    %43 = vector.broadcast %cst_25 : f32 to vector<8x128xf32>
    %44 = arith.mulf %43, %33 : vector<8x128xf32>
    %45 = arith.select %42, %33, %44 : vector<8x128xi1>, vector<8x128xf32>
    %cst_26 = arith.constant dense<0.000000e+00> : vector<128xf32>
    %46 = vector.multi_reduction <add>, %45, %cst_26 [0] : vector<8x128xf32> to vector<128xf32>
    %47 = vector.shape_cast %46 : vector<128xf32> to vector<1x128xf32>
    %cst_27 = arith.constant 8.000000e+00 : f32
    %48 = vector.broadcast %cst_27 : f32 to vector<1x128xf32>
    %49 = arith.divf %47, %48 : vector<1x128xf32>
    %50 = vector.broadcast %49 : vector<1x128xf32> to vector<8x128xf32>
    %51 = arith.subf %45, %50 : vector<8x128xf32>
    %52 = vector.broadcast %49 : vector<1x128xf32> to vector<8x128xf32>
    %53 = arith.subf %45, %52 : vector<8x128xf32>
    %54 = arith.mulf %51, %53 : vector<8x128xf32>
    %cst_28 = arith.constant dense<0.000000e+00> : vector<128xf32>
    %55 = vector.multi_reduction <add>, %54, %cst_28 [0] : vector<8x128xf32> to vector<128xf32>
    %56 = vector.shape_cast %55 : vector<128xf32> to vector<1x128xf32>
    %cst_29 = arith.constant 8.000000e+00 : f32
    %57 = vector.broadcast %cst_29 : f32 to vector<1x128xf32>
    %58 = arith.divf %56, %57 : vector<1x128xf32>
    %cst_30 = arith.constant 9.99999974E-6 : f32
    %59 = vector.broadcast %cst_30 : f32 to vector<1x128xf32>
    %60 = arith.addf %58, %59 : vector<1x128xf32>
    %61 = math.rsqrt %60 : vector<1x128xf32>
    %62 = arith.mulf %6, %61 : vector<1x128xf32>
    %63 = vector.broadcast %49 : vector<1x128xf32> to vector<8x128xf32>
    %64 = arith.subf %45, %63 : vector<8x128xf32>
    %65 = vector.broadcast %62 : vector<1x128xf32> to vector<8x128xf32>
    %66 = arith.mulf %64, %65 : vector<8x128xf32>
    %67 = vector.broadcast %7 : vector<1x128xf32> to vector<8x128xf32>
    %68 = arith.addf %66, %67 : vector<8x128xf32>
    %69 = arith.truncf %68 : vector<8x128xf32> to vector<8x128xbf16>
    %c0_31 = arith.constant 0 : index
    %c0_32 = arith.constant 0 : index
    %70 = vector.load %arg5[%c0_31, %c0_32] : memref<128x12xbf16, #tpu.memory_space<vmem>>, vector<128x12xbf16>
    %cst_33 = arith.constant dense<0.000000e+00> : vector<8x12xf32>
    %71 = tpu.matmul %69, %70, %cst_33 {dimension_numbers = #tpu.dot_dimension_numbers<[1], [0], [0], [1], [0, 0, 1, 1], [], []>} : vector<8x128xbf16>, vector<128x12xbf16>, vector<8x12xf32> -> vector<8x12xf32>
    %72 = vector.broadcast %8 : vector<1x12xf32> to vector<8x12xf32>
    %73 = arith.addf %71, %72 : vector<8x12xf32>
    %74 = vector.extract_strided_slice %73 {offsets = [0, 0], sizes = [8, 10], strides = [1, 1]} : vector<8x12xf32> to vector<8x10xf32>
    %75 = vector.extract_strided_slice %73 {offsets = [0, 10], sizes = [8, 2], strides = [1, 1]} : vector<8x12xf32> to vector<8x2xf32>
    %cst_34 = arith.constant dense<0xFF800000> : vector<8xf32>
    %76 = vector.multi_reduction <maximumf>, %74, %cst_34 [1] : vector<8x10xf32> to vector<8xf32>
    %77 = vector.shape_cast %76 : vector<8xf32> to vector<8x1xf32>
    %78 = vector.broadcast %77 : vector<8x1xf32> to vector<8x10xf32>
    %79 = arith.subf %74, %78 : vector<8x10xf32>
    %80 = math.exp %79 : vector<8x10xf32>
    %cst_35 = arith.constant dense<0.000000e+00> : vector<8xf32>
    %81 = vector.multi_reduction <add>, %80, %cst_35 [1] : vector<8x10xf32> to vector<8xf32>
    %82 = vector.shape_cast %81 : vector<8xf32> to vector<8x1xf32>
    %83 = vector.broadcast %82 : vector<8x1xf32> to vector<8x10xf32>
    %84 = arith.divf %80, %83 : vector<8x10xf32>
    %cst_36 = arith.constant 0.00999999977 : f32
    %85 = vector.broadcast %cst_36 : f32 to vector<8x2xf32>
    %86 = arith.mulf %85, %2 : vector<8x2xf32>
    %87 = arith.addf %75, %86 : vector<8x2xf32>
    %cst_37 = arith.constant 0.000000e+00 : f32
    %88 = vector.broadcast %cst_37 : f32 to vector<8x115xf32>
    %89 = tpu.concatenate %40, %84, %87, %88 in 1 : vector<8x1xf32>, vector<8x10xf32>, vector<8x2xf32>, vector<8x115xf32> -> vector<8x128xf32>
    %c0_38 = arith.constant 0 : index
    %c0_39 = arith.constant 0 : index
    %90 = vector.load %arg7[%c0_38, %c0_39] : memref<8x128xf32, #tpu.memory_space<vmem>>, vector<8x128xf32>
    tpu.vector_store %arg7[%c0_38, %c0_39], %89 {strides = array<i32>} : memref<8x128xf32, #tpu.memory_space<vmem>>, vector<8x128xf32>,
    return
  }
}

</mosaic_0001>

<bundles_post_ra>
// kernel: tpu_custom_call.1
= control target key start
LH: loop header
LB: loop body
LE: loop exit
PB: predicated region body
PF: predicated region fallthrough
CT: control target
= control target key end

     0   :  { %12 = vsyncpa [#allocation3], 0  ;;  %s3749_s0 = inlined_call_operand.vmem [shape: f32[8,784], index: 0, kind: input, shape index: {}]   ;;  %s3750_s1 = inlined_call_operand.vmem [shape: f32[8,2], index: 1, kind: input, shape index: {}]   ;;  %s3751_s2 = inlined_call_operand.hbm [shape: bf16[784,512], index: 2, kind: input, shape index: {}]   ;;  %s3752_s3 = inlined_call_operand.hbm [shape: bf16[512,256], index: 3, kind: input, shape index: {}]   ;;  %s3753_s4 = inlined_call_operand.vmem [shape: bf16[256,129], index: 4, kind: input, shape index: {}]   ;;  %s3754_s5 = inlined_call_operand.vmem [shape: bf16[128,12], index: 5, kind: input, shape index: {}]   ;;  %s3755_s6 = inlined_call_operand.vmem [shape: f32[1,1408], index: 6, kind: input, shape index: {}]   ;;  %s3756_s7 = inlined_call_operand.hbm [shape: f32[8,128], index: 7, kind: output, shape index: {}]  }
   0x1   :  { %13 = vsyncpa [#allocation6], 0 }
   0x2   :  { %14 = vsyncpa [#allocation4], 0  ;;  %s3458_s24 = smov [#allocation2]   ;;  %s3386_s28 = scalar_lea.hbm %s3751_s2, 25088 }
   0x3   :  { %s24_s25 = sshll.u32 %s3458_s24, 4  ;;  %p3387_p0 = scmp.ne.s32.totalorder %s3751_s2, %s3386_s28  ;;  %s25_s25 = int_to_ptr.vmem [resolvable:$true] %s24_s25 }
   0x4   :  { %p3390_p1 = scmp.lt.u32.totalorder %s3386_s28, %s3751_s2 }
   0x6   :  { %p3392_p2 = pnand %p3390_p1, %p3387_p0 }
   0x8   :  { %3395 = shalt.err (!%p3392_p2)
}
   0x9   :  { %s3396_s10 = scalar_lea.vmem %s25_s25, 25088  ;;  %p3401_p4 = scmp.lt.s32.totalorder %s25_s25, %s25_s25 }
   0xa   :  { %p3397_p3 = scmp.ne.s32.totalorder %s25_s25, %s3396_s10  ;;  %p3402_p5 = scmp.lt.s32.totalorder %s3396_s10, %s3396_s10 }
   0xc   :  { %p3403_p6 = por %p3402_p5, %p3401_p4 }
   0xe   :  { %p3404_p7 = pnand %p3403_p6, %p3397_p3 }
  0x10   :  { %3407 = shalt.err (!%p3404_p7)
}
  0x11   :  { %s3459_s11 = smov 256   ;;  %s3460_s12 = smov 16  }
  0x12   :  { %30 = dma.hbm_to_vmem [thread:$0]  %s3751_s2, 25088, %s25_s25, [#allocation3], %s3459_s11, %s3459_s11, %s3460_s12  }
  0x13   :  { %s3461_s15 = smov [#allocation5]   ;;  %s3408_s19 = scalar_lea.hbm %s3752_s3, 8192 }
  0x14   :  { %s36_s16 = sshll.u32 %s3461_s15, 4  ;;  %p3409_p8 = scmp.ne.s32.totalorder %s3752_s3, %s3408_s19  ;;  %s37_s16 = int_to_ptr.vmem [resolvable:$true] %s36_s16 }
  0x15   :  { %p3412_p9 = scmp.lt.u32.totalorder %s3408_s19, %s3752_s3 }
  0x17   :  { %p3414_p10 = pnand %p3412_p9, %p3409_p8 }
  0x19   :  { %3417 = shalt.err (!%p3414_p10)
}
  0x1a   :  { %s3418_s24 = scalar_lea.vmem %s37_s16, 8192  ;;  %p3423_p12 = scmp.lt.s32.totalorder %s37_s16, %s37_s16 }
  0x1b   :  { %p3419_p11 = scmp.ne.s32.totalorder %s37_s16, %s3418_s24  ;;  %p3424_p13 = scmp.lt.s32.totalorder %s3418_s24, %s3418_s24 }
  0x1d   :  { %p3425_p0 = por %p3424_p13, %p3423_p12 }
  0x1f   :  { %p3426_p1 = pnand %p3425_p0, %p3419_p11 }
  0x21   :  { %3429 = shalt.err (!%p3426_p1)
}
  0x22   :  { %s3462_s2 = smov 128   ;;  %s3463_s25 = smov 8  }
  0x23   :  { %42 = dma.hbm_to_vmem [thread:$0]  %s3752_s3, 8192, %s37_s16, [#allocation6], %s3462_s2, %s3462_s2, %s3463_s25  }
  0x24   :  { %3452 = dma.done.wait [#allocation3], 25088  }
  0x25   :  { %3453 = vsyncadd [#allocation3], 4294942208 }
  0x26   :  { %3454 = dma.done.wait [#allocation6], 8192  }
  0x27   :  { %3455 = vsyncadd [#allocation6], 4294959104  ;;  %v3464_v0 = vmov 0   ;;  %v2930_v1 = vld [vmem:[#allocation2 + $0x4] ss:$16 sps:$4 sm:$0xff]   ;;  %vm1274_vm0 = vcmask 130048  }
  0x28   :  { %1433 = vmatprep.mubr.bf16.mxu1 %v3464_v0  ;;  %v2932_v2 = vld [vmem:[#allocation2 + $0x604] ss:$16 sps:$4 sm:$0xff]   ;;  %1278 = vmatprep.subr.bf16.mxu0 %v2930_v1  ;;  %v2934_v3 = vld [vmem:[#allocation2] ss:$16 sps:$4 sm:$0xff]   ;;  %v2938_v6 = vld [vmem:[#allocation2 + $0x8] ss:$16 sps:$4 sm:$0xff]  }
  0x29   :  { %v2935_v4 = vld [vmem:[#allocation2 + $0x600] ss:$16 sps:$4 sm:$0xff]   ;;  %1401 = vmatprep.subr.bf16.mxu1 %v2932_v2  ;;  %v2936_v5 = vld [vmem:[#allocation2 + $0x24] ss:$16 sps:$4 sm:$0xff]   ;;  %1279 = vmatpush1.bf16.msra.mxu0 %v2934_v3  ;;  %v2940_v7 = vld [vmem:[#allocation2 + $0xc] ss:$16 sps:$4 sm:$0xff]  }
  0x2a   :  { %1402 = vmatpush1.bf16.msra.mxu1 %v2935_v4  ;;  %1280 = vmatprep.subr.bf16.mxu0 %v2936_v5  ;;  %v2941_v8 = vld [vmem:[#allocation2 + $0x20] ss:$16 sps:$4 sm:$0xff]   ;;  %v2942_v11 = vld [vmem:[#allocation2 + $0x44] ss:$16 sps:$4 sm:$0xff]   ;;  %v2944_v12 = vld [vmem:[#allocation2 + $0x28] ss:$16 sps:$4 sm:$0xff]  }
  0x2b   :  { %v62_v9 = vld [vmem:[%s3749_s0 + $0x30] sm:$0xff]  ;;  %1442 = vmatprep.subr.bf16.mxu1 %v2940_v7  ;;  %v2946_v13 = vld [vmem:[#allocation2 + $0x2c] ss:$16 sps:$4 sm:$0xff]   ;;  %v2950_v18 = vld [vmem:[#allocation2 + $0x48] ss:$16 sps:$4 sm:$0xff]   ;;  %vm3466_vm7 = vmmov 0  }
  0x2c   :  { %v3538_v10 = vpack.c.bf16 %v62_v9, %v62_v9  ;;  %v2947_v14 = vld [vmem:[#allocation2 + $0x40] ss:$16 sps:$4 sm:$0xff]   ;;  %v2948_v15 = vld [vmem:[#allocation2 + $0x64] ss:$16 sps:$4 sm:$0xff]   ;;  %v2952_v16 = vld [vmem:[#allocation2 + $0x4c] ss:$16 sps:$4 sm:$0xff]  }
  0x2d   :  { %1281 = vmatpush1.bf16.msra.mxu0 %v2941_v8  ;;  %v2953_v17 = vld [vmem:[#allocation2 + $0x60] ss:$16 sps:$4 sm:$0xff]   ;;  %v2954_v19 = vld [vmem:[#allocation2 + $0x84] ss:$16 sps:$4 sm:$0xff]   ;;  %v2958_v20 = vld [vmem:[#allocation2 + $0x6c] ss:$16 sps:$4 sm:$0xff]  }
  0x2e   :  { %2749 = vmatmul.mubr.msk.bf16.vlgmr.msra.gmra.mrb[0].mxu1 %vm1274_vm0, %v3538_v10  ;;  %1282 = vmatprep.subr.bf16.mxu0 %v2942_v11  ;;  %v2956_v21 = vld [vmem:[#allocation2 + $0x68] ss:$16 sps:$4 sm:$0xff]   ;;  %v2959_v22 = vld [vmem:[#allocation2 + $0x80] ss:$16 sps:$4 sm:$0xff]   ;;  %v2960_v23 = vld [vmem:[#allocation2 + $0xa4] ss:$16 sps:$4 sm:$0xff]  }
  0x2f   :  { %1443 = vmatpush1.bf16.msra.mxu1 %v2938_v6  ;;  %v2964_v24 = vld [vmem:[#allocation2 + $0x8c] ss:$16 sps:$4 sm:$0xff]   ;;  %v2965_v25 = vld [vmem:[#allocation2 + $0xa0] ss:$16 sps:$4 sm:$0xff]   ;;  %v2962_v26 = vld [vmem:[#allocation2 + $0x88] ss:$16 sps:$4 sm:$0xff]  }
  0x30   :  { %1444 = vmatprep.subr.bf16.mxu1 %v2946_v13  ;;  %v2966_v27 = vld [vmem:[#allocation2 + $0xc4] ss:$16 sps:$4 sm:$0xff]   ;;  %v2970_v28 = vld [vmem:[#allocation2 + $0xac] ss:$16 sps:$4 sm:$0xff]   ;;  %v2968_v29 = vld [vmem:[#allocation2 + $0xa8] ss:$16 sps:$4 sm:$0xff]  }
  0x31   :  { %1283 = vmatpush1.bf16.msra.mxu0 %v2947_v14  ;;  %v2971_v30 = vld [vmem:[#allocation2 + $0xc0] ss:$16 sps:$4 sm:$0xff]   ;;  %v2972_v31 = vld [vmem:[#allocation2 + $0xe4] ss:$16 sps:$4 sm:$0xff]   ;;  %v2976_v32 = vld [vmem:[#allocation2 + $0xcc] ss:$16 sps:$4 sm:$0xff]  }
  0x32   :  { %1284 = vmatprep.subr.bf16.mxu0 %v2948_v15  ;;  %v2977_v33 = vld [vmem:[#allocation2 + $0xe0] ss:$16 sps:$4 sm:$0xff]   ;;  %v2974_v34 = vld [vmem:[#allocation2 + $0xc8] ss:$16 sps:$4 sm:$0xff]   ;;  %v2978_v35 = vld [vmem:[#allocation2 + $0x104] ss:$16 sps:$4 sm:$0xff]  }
  0x33   :  { %1445 = vmatpush1.bf16.msra.mxu1 %v2944_v12  ;;  %v2982_v36 = vld [vmem:[#allocation2 + $0xec] ss:$16 sps:$4 sm:$0xff]   ;;  %v2980_v37 = vld [vmem:[#allocation2 + $0xe8] ss:$16 sps:$4 sm:$0xff]   ;;  %v2983_v38 = vld [vmem:[#allocation2 + $0x100] ss:$16 sps:$4 sm:$0xff]  }
  0x34   :  { %1446 = vmatprep.subr.bf16.mxu1 %v2952_v16  ;;  %v2984_v39 = vld [vmem:[#allocation2 + $0x124] ss:$16 sps:$4 sm:$0xff]   ;;  %v2988_v40 = vld [vmem:[#allocation2 + $0x10c] ss:$16 sps:$4 sm:$0xff]   ;;  %v2989_v41 = vld [vmem:[#allocation2 + $0x120] ss:$16 sps:$4 sm:$0xff]  }
  0x35   :  { %1285 = vmatpush1.bf16.msra.mxu0 %v2953_v17  ;;  %v2986_v42 = vld [vmem:[#allocation2 + $0x108] ss:$16 sps:$4 sm:$0xff]   ;;  %v2990_v43 = vld [vmem:[#allocation2 + $0x144] ss:$16 sps:$4 sm:$0xff]   ;;  %v2994_v44 = vld [vmem:[#allocation2 + $0x12c] ss:$16 sps:$4 sm:$0xff]  }
  0x36   :  { %1286 = vmatprep.subr.bf16.mxu0 %v2954_v19  ;;  %v2992_v45 = vld [vmem:[#allocation2 + $0x128] ss:$16 sps:$4 sm:$0xff]   ;;  %v2995_v46 = vld [vmem:[#allocation2 + $0x140] ss:$16 sps:$4 sm:$0xff]   ;;  %v2996_v47 = vld [vmem:[#allocation2 + $0x164] ss:$16 sps:$4 sm:$0xff]  }
  0x37   :  { %1447 = vmatpush1.bf16.msra.mxu1 %v2950_v18  ;;  %v3000_v48 = vld [vmem:[#allocation2 + $0x14c] ss:$16 sps:$4 sm:$0xff]   ;;  %v3001_v50 = vld [vmem:[#allocation2 + $0x160] ss:$16 sps:$4 sm:$0xff]   ;;  %v2998_v52 = vld [vmem:[#allocation2 + $0x148] ss:$16 sps:$4 sm:$0xff]  }
  0x38   :  { %1448 = vmatprep.subr.bf16.mxu1 %v2958_v20  ;;  %v57_v49 = vld [vmem:[%s3749_s0 + $0x8] sm:$0xff]  ;;  %v3002_v53 = vld [vmem:[#allocation2 + $0x184] ss:$16 sps:$4 sm:$0xff]   ;;  %v3007_v56 = vld [vmem:[#allocation2 + $0x180] ss:$16 sps:$4 sm:$0xff]   ;;  %s3467_s24 = smov 10  }
  0x39   :  { %1287 = vmatpush1.bf16.msra.mxu0 %v2959_v22  ;;  %v64_v51 = vpack.c.bf16 %v57_v49, %v57_v49  ;;  %v3006_v54 = vld [vmem:[#allocation2 + $0x16c] ss:$16 sps:$4 sm:$0xff]   ;;  %v3004_v55 = vld [vmem:[#allocation2 + $0x168] ss:$16 sps:$4 sm:$0xff]   ;;  %v3008_v57 = vld [vmem:[#allocation2 + $0x1a4] ss:$16 sps:$4 sm:$0xff]  }
  0x3a   :  { %1288 = vmatprep.subr.bf16.mxu0 %v2960_v23  ;;  %v3012_v58 = vld [vmem:[#allocation2 + $0x18c] ss:$16 sps:$4 sm:$0xff]   ;;  %v3010_v59 = vld [vmem:[#allocation2 + $0x188] ss:$16 sps:$4 sm:$0xff]   ;;  %v3013_v60 = vld [vmem:[#allocation2 + $0x1a0] ss:$16 sps:$4 sm:$0xff]  }
  0x3b   :  { %1449 = vmatpush1.bf16.msra.mxu1 %v2956_v21  ;;  %1310 = vmatprep.mubr.bf16.mxu0 %v64_v51  ;;  %v3014_v61 = vld [vmem:[#allocation2 + $0x1c4] ss:$16 sps:$4 sm:$0xff]   ;;  %v3018_v62 = vld [vmem:[#allocation2 + $0x1ac] ss:$16 sps:$4 sm:$0xff]   ;;  %v3016_v63 = vld [vmem:[#allocation2 + $0x1a8] ss:$16 sps:$4 sm:$0xff]  }
  0x3c   :  { %1450 = vmatprep.subr.bf16.mxu1 %v2964_v24  ;;  %1474 = vmatprep.mubr.bf16.mxu1 %v64_v51  ;;  %v3019_v1 = vld [vmem:[#allocation2 + $0x1c0] ss:$16 sps:$4 sm:$0xff]   ;;  %v3020_v2 = vld [vmem:[#allocation2 + $0x1e4] ss:$16 sps:$4 sm:$0xff]   ;;  %v3024_v3 = vld [vmem:[#allocation2 + $0x1cc] ss:$16 sps:$4 sm:$0xff]  }
  0x3d   :  { %1289 = vmatpush1.bf16.msra.mxu0 %v2965_v25  ;;  %v3022_v4 = vld [vmem:[#allocation2 + $0x1c8] ss:$16 sps:$4 sm:$0xff]   ;;  %v3025_v5 = vld [vmem:[#allocation2 + $0x1e0] ss:$16 sps:$4 sm:$0xff]   ;;  %v3028_v7 = vld [vmem:[#allocation2 + $0x204] ss:$16 sps:$4 sm:$0xff]  }
  0x3e   :  { %1290 = vmatprep.subr.bf16.mxu0 %v2966_v27  ;;  %v56_v6 = vld [vmem:[%s3749_s0] sm:$0xff]  ;;  %v3031_v8 = vld [vmem:[#allocation2 + $0x1ec] ss:$16 sps:$4 sm:$0xff]   ;;  %v3029_v12 = vld [vmem:[#allocation2 + $0x1e8] ss:$16 sps:$4 sm:$0xff]   ;;  %vm2504_vm9 = vcmask 80896  }
  0x3f   :  { %1451 = vmatpush1.bf16.msra.mxu1 %v2962_v26  ;;  %v63_v9 = vpack.c.bf16 %v56_v6, %v56_v6  ;;  %v3026_v11 = vld [vmem:[#allocation2 + $0x200] ss:$16 sps:$4 sm:$0xff]   ;;  %v3034_v13 = vld [vmem:[#allocation2 + $0x224] ss:$16 sps:$4 sm:$0xff]   ;;  %v3037_v14 = vld [vmem:[#allocation2 + $0x20c] ss:$16 sps:$4 sm:$0xff]  }
  0x40   :  { %1452 = vmatprep.subr.bf16.mxu1 %v2970_v28  ;;  %v3032_v15 = vld [vmem:[#allocation2 + $0x220] ss:$16 sps:$4 sm:$0xff]   ;;  %v3035_v16 = vld [vmem:[#allocation2 + $0x208] ss:$16 sps:$4 sm:$0xff]   ;;  %v3040_v17 = vld [vmem:[#allocation2 + $0x244] ss:$16 sps:$4 sm:$0xff]  }
  0x41   :  { %1291 = vmatpush1.bf16.msra.mxu0 %v2971_v30  ;;  %v3043_v18 = vld [vmem:[#allocation2 + $0x22c] ss:$16 sps:$4 sm:$0xff]   ;;  %v3038_v19 = vld [vmem:[#allocation2 + $0x240] ss:$16 sps:$4 sm:$0xff]   ;;  %v3041_v20 = vld [vmem:[#allocation2 + $0x228] ss:$16 sps:$4 sm:$0xff]  }
  0x42   :  { %1292 = vmatprep.subr.bf16.mxu0 %v2972_v31  ;;  %v3046_v21 = vld [vmem:[#allocation2 + $0x264] ss:$16 sps:$4 sm:$0xff]   ;;  %v3049_v22 = vld [vmem:[#allocation2 + $0x24c] ss:$16 sps:$4 sm:$0xff]   ;;  %v3044_v23 = vld [vmem:[#allocation2 + $0x260] ss:$16 sps:$4 sm:$0xff]  }
  0x43   :  { %1453 = vmatpush1.bf16.msra.mxu1 %v2968_v29  ;;  %v3047_v24 = vld [vmem:[#allocation2 + $0x248] ss:$16 sps:$4 sm:$0xff]   ;;  %v3052_v25 = vld [vmem:[#allocation2 + $0x284] ss:$16 sps:$4 sm:$0xff]   ;;  %v3055_v26 = vld [vmem:[#allocation2 + $0x26c] ss:$16 sps:$4 sm:$0xff]  }
  0x44   :  { %1454 = vmatprep.subr.bf16.mxu1 %v2976_v32  ;;  %v3050_v27 = vld [vmem:[#allocation2 + $0x280] ss:$16 sps:$4 sm:$0xff]   ;;  %v3053_v28 = vld [vmem:[#allocation2 + $0x268] ss:$16 sps:$4 sm:$0xff]   ;;  %v3058_v29 = vld [vmem:[#allocation2 + $0x2a4] ss:$16 sps:$4 sm:$0xff]  }
  0x45   :  { %1293 = vmatpush1.bf16.msra.mxu0 %v2977_v33  ;;  %v3061_v30 = vld [vmem:[#allocation2 + $0x28c] ss:$16 sps:$4 sm:$0xff]   ;;  %v3056_v31 = vld [vmem:[#allocation2 + $0x2a0] ss:$16 sps:$4 sm:$0xff]   ;;  %v3059_v32 = vld [vmem:[#allocation2 + $0x288] ss:$16 sps:$4 sm:$0xff]  }
  0x46   :  { %1294 = vmatprep.subr.bf16.mxu0 %v2978_v35  ;;  %v3064_v33 = vld [vmem:[#allocation2 + $0x2c4] ss:$16 sps:$4 sm:$0xff]   ;;  %v59_v35 = vld [vmem:[%s3749_s0 + $0x18] sm:$0xff]  ;;  %v3080_v49 = vld [vmem:[#allocation2 + $0x320] ss:$16 sps:$4 sm:$0xff]   ;;  %s3468_s29 = smov 1  }
  0x47   :  { %1455 = vmatpush1.bf16.msra.mxu1 %v2974_v34  ;;  %v3067_v34 = vld [vmem:[#allocation2 + $0x2ac] ss:$16 sps:$4 sm:$0xff]   ;;  %v3088_v51 = vld [vmem:[#allocation2 + $0x344] ss:$16 sps:$4 sm:$0xff]   ;;  %v3110_v6 = vld [vmem:[#allocation2 + $0x3c0] ss:$16 sps:$4 sm:$0xff]  }
  0x48   :  { %1456 = vmatprep.subr.bf16.mxu1 %v2982_v36  ;;  %v66_v36 = vpack.c.bf16 %v59_v35, %v59_v35  ;;  %v3146_v35 = vld [vmem:[#allocation2 + $0x480] ss:$16 sps:$4 sm:$0xff]   ;;  %vm2530_vm10 = vcmask 7168   ;;  %vm2532_vm11 = vcmask 89088   ;;  %vm2534_vm12 = vcmask 105472  }
  0x49   :  { %1295 = vmatpush1.bf16.msra.mxu0 %v2983_v38  ;;  %v3065_v38 = vld [vmem:[#allocation2 + $0x2a8] ss:$16 sps:$4 sm:$0xff]  }
  0x4a   :  { %1296 = vmatprep.subr.bf16.mxu0 %v2984_v39  ;;  %v3070_v39 = vld [vmem:[#allocation2 + $0x2e4] ss:$16 sps:$4 sm:$0xff]  }
  0x4b   :  { %1457 = vmatpush1.bf16.msra.mxu1 %v2980_v37  ;;  %v3062_v37 = vld [vmem:[#allocation2 + $0x2c0] ss:$16 sps:$4 sm:$0xff]  }
  0x4c   :  { %1458 = vmatprep.subr.bf16.mxu1 %v2988_v40  ;;  %v3073_v40 = vld [vmem:[#allocation2 + $0x2cc] ss:$16 sps:$4 sm:$0xff]  }
  0x4d   :  { %1297 = vmatpush1.bf16.msra.mxu0 %v2989_v41  ;;  %v3068_v41 = vld [vmem:[#allocation2 + $0x2e0] ss:$16 sps:$4 sm:$0xff]  }
  0x4e   :  { %1298 = vmatprep.subr.bf16.mxu0 %v2990_v43  ;;  %v3076_v43 = vld [vmem:[#allocation2 + $0x304] ss:$16 sps:$4 sm:$0xff]  }
  0x4f   :  { %1459 = vmatpush1.bf16.msra.mxu1 %v2986_v42  ;;  %v3071_v42 = vld [vmem:[#allocation2 + $0x2c8] ss:$16 sps:$4 sm:$0xff]  }
  0x50   :  { %1460 = vmatprep.subr.bf16.mxu1 %v2994_v44  ;;  %v3079_v44 = vld [vmem:[#allocation2 + $0x2ec] ss:$16 sps:$4 sm:$0xff]  }
  0x51   :  { %1299 = vmatpush1.bf16.msra.mxu0 %v2995_v46  ;;  %v3077_v46 = vld [vmem:[#allocation2 + $0x2e8] ss:$16 sps:$4 sm:$0xff]  }
  0x52   :  { %1300 = vmatprep.subr.bf16.mxu0 %v2996_v47  ;;  %v3082_v47 = vld [vmem:[#allocation2 + $0x324] ss:$16 sps:$4 sm:$0xff]  }
  0x53   :  { %1461 = vmatpush1.bf16.msra.mxu1 %v2992_v45  ;;  %v3074_v45 = vld [vmem:[#allocation2 + $0x300] ss:$16 sps:$4 sm:$0xff]  }
  0x54   :  { %1462 = vmatprep.subr.bf16.mxu1 %v3000_v48  ;;  %v3085_v48 = vld [vmem:[#allocation2 + $0x30c] ss:$16 sps:$4 sm:$0xff]  }
  0x55   :  { %1301 = vmatpush1.bf16.msra.mxu0 %v3001_v50  ;;  %v3083_v50 = vld [vmem:[#allocation2 + $0x308] ss:$16 sps:$4 sm:$0xff]  }
  0x56   :  { %1302 = vmatprep.subr.bf16.mxu0 %v3002_v53  ;;  %v3086_v53 = vld [vmem:[#allocation2 + $0x340] ss:$16 sps:$4 sm:$0xff]  }
  0x57   :  { %1463 = vmatpush1.bf16.msra.mxu1 %v2998_v52  ;;  %v3091_v52 = vld [vmem:[#allocation2 + $0x32c] ss:$16 sps:$4 sm:$0xff]  }
  0x58   :  { %1464 = vmatprep.subr.bf16.mxu1 %v3006_v54  ;;  %v3089_v54 = vld [vmem:[#allocation2 + $0x328] ss:$16 sps:$4 sm:$0xff]  }
  0x59   :  { %1303 = vmatpush1.bf16.msra.mxu0 %v3007_v56  ;;  %v3097_v56 = vld [vmem:[#allocation2 + $0x34c] ss:$16 sps:$4 sm:$0xff]  }
  0x5a   :  { %1304 = vmatprep.subr.bf16.mxu0 %v3008_v57  ;;  %v3092_v57 = vld [vmem:[#allocation2 + $0x360] ss:$16 sps:$4 sm:$0xff]  }
  0x5b   :  { %1465 = vmatpush1.bf16.msra.mxu1 %v3004_v55  ;;  %v3094_v55 = vld [vmem:[#allocation2 + $0x364] ss:$16 sps:$4 sm:$0xff]  }
  0x5c   :  { %1466 = vmatprep.subr.bf16.mxu1 %v3012_v58  ;;  %v3095_v58 = vld [vmem:[#allocation2 + $0x348] ss:$16 sps:$4 sm:$0xff]  }
  0x5d   :  { %1305 = vmatpush1.bf16.msra.mxu0 %v3013_v60  ;;  %v3103_v60 = vld [vmem:[#allocation2 + $0x36c] ss:$16 sps:$4 sm:$0xff]  }
  0x5e   :  { %1306 = vmatprep.subr.bf16.mxu0 %v3014_v61  ;;  %v3098_v61 = vld [vmem:[#allocation2 + $0x380] ss:$16 sps:$4 sm:$0xff]  }
  0x5f   :  { %1467 = vmatpush1.bf16.msra.mxu1 %v3010_v59  ;;  %v3100_v59 = vld [vmem:[#allocation2 + $0x384] ss:$16 sps:$4 sm:$0xff]  }
  0x60   :  { %1468 = vmatprep.subr.bf16.mxu1 %v3018_v62  ;;  %v3101_v62 = vld [vmem:[#allocation2 + $0x368] ss:$16 sps:$4 sm:$0xff]  }
  0x61   :  { %1307 = vmatpush1.bf16.msra.mxu0 %v3019_v1  ;;  %v3109_v1 = vld [vmem:[#allocation2 + $0x38c] ss:$16 sps:$4 sm:$0xff]  }
  0x62   :  { %1308 = vmatprep.subr.bf16.mxu0 %v3020_v2  ;;  %v3104_v2 = vld [vmem:[#allocation2 + $0x3a0] ss:$16 sps:$4 sm:$0xff]  }
  0x63   :  { %1469 = vmatpush1.bf16.msra.mxu1 %v3016_v63  ;;  %v3106_v63 = vld [vmem:[#allocation2 + $0x3a4] ss:$16 sps:$4 sm:$0xff]  }
  0x64   :  { %1470 = vmatprep.subr.bf16.mxu1 %v3024_v3  ;;  %v3107_v3 = vld [vmem:[#allocation2 + $0x388] ss:$16 sps:$4 sm:$0xff]  }
  0x65   :  { %1309 = vmatpush1.bf16.msra.mxu0 %v3025_v5  ;;  %v3115_v5 = vld [vmem:[#allocation2 + $0x3ac] ss:$16 sps:$4 sm:$0xff]  }
  0x66   :  { %1319 = vmatprep.subr.bf16.mxu0 %v3028_v7  ;;  %v3113_v7 = vld [vmem:[#allocation2 + $0x3a8] ss:$16 sps:$4 sm:$0xff]  }
  0x67   :  { %1471 = vmatpush1.bf16.msra.mxu1 %v3022_v4  ;;  %v3112_v4 = vld [vmem:[#allocation2 + $0x3c4] ss:$16 sps:$4 sm:$0xff]  }
  0x68   :  { %1472 = vmatprep.subr.bf16.mxu1 %v3031_v8  ;;  %1311 = vmatmul.mubr.bf16.vlgmr.msra.gmra.mrb[0].mxu0 %v63_v9  ;;  %v3118_v8 = vld [vmem:[#allocation2 + $0x3e4] ss:$16 sps:$4 sm:$0xff]  }
  0x69   :  { %1320 = vmatpush1.bf16.msra.mxu0 %v3026_v11  ;;  %1351 = vmatprep.mubr.bf16.mxu0 %v66_v36  ;;  %v3116_v11 = vld [vmem:[#allocation2 + $0x3e0] ss:$16 sps:$4 sm:$0xff]  }
  0x6a   :  { %1321 = vmatprep.subr.bf16.mxu0 %v3034_v13  ;;  %v3119_v13 = vld [vmem:[#allocation2 + $0x3c8] ss:$16 sps:$4 sm:$0xff]  }
  0x6b   :  { %1473 = vmatpush1.bf16.msra.mxu1 %v3029_v12  ;;  %v58_v12 = vld [vmem:[%s3749_s0 + $0x10] sm:$0xff] }
  0x6c   :  { %1483 = vmatprep.subr.bf16.mxu1 %v3037_v14  ;;  %v3124_v14 = vld [vmem:[#allocation2 + $0x404] ss:$16 sps:$4 sm:$0xff]  }
  0x6d   :  { %1322 = vmatpush1.bf16.msra.mxu0 %v3032_v15  ;;  %v3127_v15 = vld [vmem:[#allocation2 + $0x3ec] ss:$16 sps:$4 sm:$0xff]  }
  0x6e   :  { %1475 = vmatmul.mubr.bf16.vlgmr.msra.gmra.mrb[4].mxu1 %v63_v9  ;;  %1323 = vmatprep.subr.bf16.mxu0 %v3040_v17  ;;  %v3121_v9 = vld [vmem:[#allocation2 + $0x3cc] ss:$16 sps:$4 sm:$0xff]   ;;  %v3122_v17 = vld [vmem:[#allocation2 + $0x400] ss:$16 sps:$4 sm:$0xff]  }
  0x6f   :  { %1484 = vmatpush1.bf16.msra.mxu1 %v3035_v16  ;;  %1515 = vmatprep.mubr.bf16.mxu1 %v66_v36  ;;  %v65_v16 = vpack.c.bf16 %v58_v12, %v58_v12  ;;  %v3149_v36 = vld [vmem:[#allocation2 + $0x468] ss:$16 sps:$4 sm:$0xff]   ;;  %v3211_v12 = vld [vmem:[#allocation2 + $0x5ac] ss:$16 sps:$4 sm:$0xff]  }
  0x70   :  { %1485 = vmatprep.subr.bf16.mxu1 %v3043_v18  ;;  %v3125_v18 = vld [vmem:[#allocation2 + $0x3e8] ss:$16 sps:$4 sm:$0xff]  }
  0x71   :  { %1324 = vmatpush1.bf16.msra.mxu0 %v3038_v19  ;;  %v3130_v19 = vld [vmem:[#allocation2 + $0x424] ss:$16 sps:$4 sm:$0xff]  }
  0x72   :  { %1325 = vmatprep.subr.bf16.mxu0 %v3046_v21  ;;  %v3133_v21 = vld [vmem:[#allocation2 + $0x40c] ss:$16 sps:$4 sm:$0xff]  }
  0x73   :  { %1486 = vmatpush1.bf16.msra.mxu1 %v3041_v20  ;;  %v61_v20 = vld [vmem:[%s3749_s0 + $0x28] sm:$0xff] }
  0x74   :  { %1487 = vmatprep.subr.bf16.mxu1 %v3049_v22  ;;  %v68_v22 = vpack.c.bf16 %v61_v20, %v61_v20  ;;  %v3226_v20 = vld [vmem:[#allocation5 + $0x4] ss:$8 sps:$4 sm:$0xff]  }
  0x75   :  { %1326 = vmatpush1.bf16.msra.mxu0 %v3044_v23  ;;  %v3128_v23 = vld [vmem:[#allocation2 + $0x420] ss:$16 sps:$4 sm:$0xff]  }
  0x76   :  { %1327 = vmatprep.subr.bf16.mxu0 %v3052_v25  ;;  %v3136_v25 = vld [vmem:[#allocation2 + $0x444] ss:$16 sps:$4 sm:$0xff]  }
  0x77   :  { %1488 = vmatpush1.bf16.msra.mxu1 %v3047_v24  ;;  %v3131_v24 = vld [vmem:[#allocation2 + $0x408] ss:$16 sps:$4 sm:$0xff]  }
  0x78   :  { %1489 = vmatprep.subr.bf16.mxu1 %v3055_v26  ;;  %v3139_v26 = vld [vmem:[#allocation2 + $0x42c] ss:$16 sps:$4 sm:$0xff]  }
  0x79   :  { %1328 = vmatpush1.bf16.msra.mxu0 %v3050_v27  ;;  %v3134_v27 = vld [vmem:[#allocation2 + $0x440] ss:$16 sps:$4 sm:$0xff]  }
  0x7a   :  { %1329 = vmatprep.subr.bf16.mxu0 %v3058_v29  ;;  %v3142_v29 = vld [vmem:[#allocation2 + $0x464] ss:$16 sps:$4 sm:$0xff]  }
  0x7b   :  { %1490 = vmatpush1.bf16.msra.mxu1 %v3053_v28  ;;  %v3137_v28 = vld [vmem:[#allocation2 + $0x428] ss:$16 sps:$4 sm:$0xff]  }
  0x7c   :  { %1491 = vmatprep.subr.bf16.mxu1 %v3061_v30  ;;  %v3145_v30 = vld [vmem:[#allocation2 + $0x44c] ss:$16 sps:$4 sm:$0xff]  }
  0x7d   :  { %1330 = vmatpush1.bf16.msra.mxu0 %v3056_v31  ;;  %v3140_v31 = vld [vmem:[#allocation2 + $0x460] ss:$16 sps:$4 sm:$0xff]  }
  0x7e   :  { %1331 = vmatprep.subr.bf16.mxu0 %v3064_v33  ;;  %v3148_v33 = vld [vmem:[#allocation2 + $0x484] ss:$16 sps:$4 sm:$0xff]  }
  0x7f   :  { %1492 = vmatpush1.bf16.msra.mxu1 %v3059_v32  ;;  %v3143_v32 = vld [vmem:[#allocation2 + $0x448] ss:$16 sps:$4 sm:$0xff]  }
  0x80   :  { %1493 = vmatprep.subr.bf16.mxu1 %v3067_v34  ;;  %v3151_v34 = vld [vmem:[#allocation2 + $0x46c] ss:$16 sps:$4 sm:$0xff]  }
  0x81   :  { %1332 = vmatpush1.bf16.msra.mxu0 %v3062_v37  ;;  %v3154_v37 = vld [vmem:[#allocation2 + $0x4a4] ss:$16 sps:$4 sm:$0xff]  }
  0x82   :  { %1333 = vmatprep.subr.bf16.mxu0 %v3070_v39  ;;  %v3152_v39 = vld [vmem:[#allocation2 + $0x4a0] ss:$16 sps:$4 sm:$0xff]  }
  0x83   :  { %1494 = vmatpush1.bf16.msra.mxu1 %v3065_v38  ;;  %v3157_v38 = vld [vmem:[#allocation2 + $0x48c] ss:$16 sps:$4 sm:$0xff]  }
  0x84   :  { %1495 = vmatprep.subr.bf16.mxu1 %v3073_v40  ;;  %v3155_v40 = vld [vmem:[#allocation2 + $0x488] ss:$16 sps:$4 sm:$0xff]  }
  0x85   :  { %1334 = vmatpush1.bf16.msra.mxu0 %v3068_v41  ;;  %v3160_v41 = vld [vmem:[#allocation2 + $0x4c4] ss:$16 sps:$4 sm:$0xff]  }
  0x86   :  { %1335 = vmatprep.subr.bf16.mxu0 %v3076_v43  ;;  %v3158_v43 = vld [vmem:[#allocation2 + $0x4c0] ss:$16 sps:$4 sm:$0xff]  }
  0x87   :  { %1496 = vmatpush1.bf16.msra.mxu1 %v3071_v42  ;;  %v3163_v42 = vld [vmem:[#allocation2 + $0x4ac] ss:$16 sps:$4 sm:$0xff]  }
  0x88   :  { %1497 = vmatprep.subr.bf16.mxu1 %v3079_v44  ;;  %v3161_v44 = vld [vmem:[#allocation2 + $0x4a8] ss:$16 sps:$4 sm:$0xff]  }
  0x89   :  { %1336 = vmatpush1.bf16.msra.mxu0 %v3074_v45  ;;  %v3166_v45 = vld [vmem:[#allocation2 + $0x4e4] ss:$16 sps:$4 sm:$0xff]  }
  0x8a   :  { %1337 = vmatprep.subr.bf16.mxu0 %v3082_v47  ;;  %v3164_v47 = vld [vmem:[#allocation2 + $0x4e0] ss:$16 sps:$4 sm:$0xff]  }
  0x8b   :  { %1498 = vmatpush1.bf16.msra.mxu1 %v3077_v46  ;;  %v3169_v46 = vld [vmem:[#allocation2 + $0x4cc] ss:$16 sps:$4 sm:$0xff]  }
  0x8c   :  { %1499 = vmatprep.subr.bf16.mxu1 %v3085_v48  ;;  %v3167_v48 = vld [vmem:[#allocation2 + $0x4c8] ss:$16 sps:$4 sm:$0xff]  }
  0x8d   :  { %1338 = vmatpush1.bf16.msra.mxu0 %v3080_v49  ;;  %v3172_v49 = vld [vmem:[#allocation2 + $0x504] ss:$16 sps:$4 sm:$0xff]  }
  0x8e   :  { %1339 = vmatprep.subr.bf16.mxu0 %v3088_v51  ;;  %v3170_v51 = vld [vmem:[#allocation2 + $0x500] ss:$16 sps:$4 sm:$0xff]  }
  0x8f   :  { %1500 = vmatpush1.bf16.msra.mxu1 %v3083_v50  ;;  %v3175_v50 = vld [vmem:[#allocation2 + $0x4ec] ss:$16 sps:$4 sm:$0xff]  }
  0x90   :  { %1501 = vmatprep.subr.bf16.mxu1 %v3091_v52  ;;  %v3173_v52 = vld [vmem:[#allocation2 + $0x4e8] ss:$16 sps:$4 sm:$0xff]  }
  0x91   :  { %1340 = vmatpush1.bf16.msra.mxu0 %v3086_v53  ;;  %v3178_v53 = vld [vmem:[#allocation2 + $0x524] ss:$16 sps:$4 sm:$0xff]  }
  0x92   :  { %1341 = vmatprep.subr.bf16.mxu0 %v3094_v55  ;;  %v3176_v55 = vld [vmem:[#allocation2 + $0x520] ss:$16 sps:$4 sm:$0xff]  }
  0x93   :  { %1502 = vmatpush1.bf16.msra.mxu1 %v3089_v54  ;;  %v3181_v54 = vld [vmem:[#allocation2 + $0x50c] ss:$16 sps:$4 sm:$0xff]  }
  0x94   :  { %1503 = vmatprep.subr.bf16.mxu1 %v3097_v56  ;;  %v3179_v56 = vld [vmem:[#allocation2 + $0x508] ss:$16 sps:$4 sm:$0xff]  }
  0x95   :  { %1342 = vmatpush1.bf16.msra.mxu0 %v3092_v57  ;;  %v3184_v57 = vld [vmem:[#allocation2 + $0x544] ss:$16 sps:$4 sm:$0xff]  }
  0x96   :  { %1343 = vmatprep.subr.bf16.mxu0 %v3100_v59  ;;  %v3182_v59 = vld [vmem:[#allocation2 + $0x540] ss:$16 sps:$4 sm:$0xff]  }
  0x97   :  { %1504 = vmatpush1.bf16.msra.mxu1 %v3095_v58  ;;  %v3187_v58 = vld [vmem:[#allocation2 + $0x52c] ss:$16 sps:$4 sm:$0xff]  }
  0x98   :  { %1505 = vmatprep.subr.bf16.mxu1 %v3103_v60  ;;  %v3185_v60 = vld [vmem:[#allocation2 + $0x528] ss:$16 sps:$4 sm:$0xff]  }
  0x99   :  { %1344 = vmatpush1.bf16.msra.mxu0 %v3098_v61  ;;  %v3190_v61 = vld [vmem:[#allocation2 + $0x564] ss:$16 sps:$4 sm:$0xff]  }
  0x9a   :  { %1345 = vmatprep.subr.bf16.mxu0 %v3106_v63  ;;  %v3188_v63 = vld [vmem:[#allocation2 + $0x560] ss:$16 sps:$4 sm:$0xff]  }
  0x9b   :  { %1506 = vmatpush1.bf16.msra.mxu1 %v3101_v62  ;;  %v3193_v62 = vld [vmem:[#allocation2 + $0x54c] ss:$16 sps:$4 sm:$0xff]  }
  0x9c   :  { %1507 = vmatprep.subr.bf16.mxu1 %v3109_v1  ;;  %v3191_v1 = vld [vmem:[#allocation2 + $0x548] ss:$16 sps:$4 sm:$0xff]  }
  0x9d   :  { %1346 = vmatpush1.bf16.msra.mxu0 %v3104_v2  ;;  %v3196_v2 = vld [vmem:[#allocation2 + $0x584] ss:$16 sps:$4 sm:$0xff]  }
  0x9e   :  { %1347 = vmatprep.subr.bf16.mxu0 %v3112_v4  ;;  %v3194_v4 = vld [vmem:[#allocation2 + $0x580] ss:$16 sps:$4 sm:$0xff]  }
  0x9f   :  { %1508 = vmatpush1.bf16.msra.mxu1 %v3107_v3  ;;  %v3199_v3 = vld [vmem:[#allocation2 + $0x56c] ss:$16 sps:$4 sm:$0xff]  }
  0xa0   :  { %1509 = vmatprep.subr.bf16.mxu1 %v3115_v5  ;;  %v3197_v5 = vld [vmem:[#allocation2 + $0x568] ss:$16 sps:$4 sm:$0xff]  }
  0xa1   :  { %1348 = vmatpush1.bf16.msra.mxu0 %v3110_v6  ;;  %v3202_v6 = vld [vmem:[#allocation2 + $0x5a4] ss:$16 sps:$4 sm:$0xff]  }
  0xa2   :  { %1349 = vmatprep.subr.bf16.mxu0 %v3118_v8  ;;  %v3200_v8 = vld [vmem:[#allocation2 + $0x5a0] ss:$16 sps:$4 sm:$0xff]  }
  0xa3   :  { %1510 = vmatpush1.bf16.msra.mxu1 %v3113_v7  ;;  %v3205_v7 = vld [vmem:[#allocation2 + $0x58c] ss:$16 sps:$4 sm:$0xff]  }
  0xa4   :  { %1511 = vmatprep.subr.bf16.mxu1 %v3121_v9  ;;  %v3203_v9 = vld [vmem:[#allocation2 + $0x588] ss:$16 sps:$4 sm:$0xff]  }
  0xa5   :  { %1350 = vmatpush1.bf16.msra.mxu0 %v3116_v11  ;;  %v3208_v11 = vld [vmem:[#allocation2 + $0x5c4] ss:$16 sps:$4 sm:$0xff]  }
  0xa6   :  { %1360 = vmatprep.subr.bf16.mxu0 %v3124_v14  ;;  %v3209_v14 = vld [vmem:[#allocation2 + $0x5a8] ss:$16 sps:$4 sm:$0xff]  }
  0xa7   :  { %1512 = vmatpush1.bf16.msra.mxu1 %v3119_v13  ;;  %v3206_v13 = vld [vmem:[#allocation2 + $0x5c0] ss:$16 sps:$4 sm:$0xff]  }
  0xa8   :  { %1513 = vmatprep.subr.bf16.mxu1 %v3127_v15  ;;  %1352 = vmatmul.mubr.bf16.vlgmr.msra.gmra.mrb[0].mxu0 %v65_v16  ;;  %v3214_v15 = vld [vmem:[#allocation2 + $0x5e4] ss:$16 sps:$4 sm:$0xff]  }
  0xa9   :  { %1361 = vmatpush1.bf16.msra.mxu0 %v3122_v17  ;;  %1392 = vmatprep.mubr.bf16.mxu0 %v68_v22  ;;  %v3212_v17 = vld [vmem:[#allocation2 + $0x5e0] ss:$16 sps:$4 sm:$0xff]  }
  0xaa   :  { %1362 = vmatprep.subr.bf16.mxu0 %v3130_v19  ;;  %v3215_v19 = vld [vmem:[#allocation2 + $0x5c8] ss:$16 sps:$4 sm:$0xff]  }
  0xab   :  { %1514 = vmatpush1.bf16.msra.mxu1 %v3125_v18  ;;  %v60_v18 = vld [vmem:[%s3749_s0 + $0x20] sm:$0xff] }
  0xac   :  { %1524 = vmatprep.subr.bf16.mxu1 %v3133_v21  ;;  %v3220_v21 = vld [vmem:[#allocation2 + $0x5ec] ss:$16 sps:$4 sm:$0xff]  }
  0xad   :  { %1363 = vmatpush1.bf16.msra.mxu0 %v3128_v23  ;;  %v3224_v23 = vld [vmem:[#allocation5] ss:$8 sps:$4 sm:$0xff]  }
  0xae   :  { %1516 = vmatmul.mubr.bf16.vlgmr.msra.gmra.mrb[4].mxu1 %v65_v16  ;;  %1364 = vmatprep.subr.bf16.mxu0 %v3136_v25  ;;  %v3217_v16 = vld [vmem:[#allocation2 + $0x5cc] ss:$16 sps:$4 sm:$0xff]  }
  0xaf   :  { %1525 = vmatpush1.bf16.msra.mxu1 %v3131_v24  ;;  %1556 = vmatprep.mubr.bf16.mxu1 %v68_v22  ;;  %v67_v22 = vpack.c.bf16 %v60_v18, %v60_v18  ;;  %v3218_v24 = vld [vmem:[#allocation2 + $0x5e8] ss:$16 sps:$4 sm:$0xff]   ;;  %v3229_v25 = vld [vmem:[#allocation5 + $0x14] ss:$8 sps:$4 sm:$0xff]   ;;  %v3352_v18 = vld [vmem:[%s3753_s4 + $0xa4] ss:$8 sps:$4 sm:$0xff]  }
  0xb0   :  { %1526 = vmatprep.subr.bf16.mxu1 %v3139_v26  ;;  %v3223_v26 = vld [vmem:[#allocation2 + $0x60c] ss:$16 sps:$4 sm:$0xff]  }
  0xb1   :  { %1365 = vmatpush1.bf16.msra.mxu0 %v3134_v27  ;;  %v3227_v27 = vld [vmem:[#allocation5 + $0x10] ss:$8 sps:$4 sm:$0xff]  }
  0xb2   :  { %1366 = vmatprep.subr.bf16.mxu0 %v3142_v29  ;;  %v3232_v29 = vld [vmem:[#allocation5 + $0x24] ss:$8 sps:$4 sm:$0xff]  }
  0xb3   :  { %1527 = vmatpush1.bf16.msra.mxu1 %v3137_v28  ;;  %v3221_v28 = vld [vmem:[#allocation2 + $0x608] ss:$16 sps:$4 sm:$0xff]  }
  0xb4   :  { %1528 = vmatprep.subr.bf16.mxu1 %v3145_v30  ;;  %v3230_v30 = vld [vmem:[#allocation5 + $0x20] ss:$8 sps:$4 sm:$0xff]  }
  0xb5   :  { %1367 = vmatpush1.bf16.msra.mxu0 %v3140_v31  ;;  %v3235_v31 = vld [vmem:[#allocation5 + $0x34] ss:$8 sps:$4 sm:$0xff]  }
  0xb6   :  { %1368 = vmatprep.subr.bf16.mxu0 %v3148_v33  ;;  %v3238_v33 = vld [vmem:[#allocation5 + $0x44] ss:$8 sps:$4 sm:$0xff]  }
  0xb7   :  { %1529 = vmatpush1.bf16.msra.mxu1 %v3143_v32  ;;  %v3233_v32 = vld [vmem:[#allocation5 + $0x30] ss:$8 sps:$4 sm:$0xff]  }
  0xb8   :  { %1530 = vmatprep.subr.bf16.mxu1 %v3151_v34  ;;  %v3236_v34 = vld [vmem:[#allocation5 + $0x40] ss:$8 sps:$4 sm:$0xff]  }
  0xb9   :  { %1369 = vmatpush1.bf16.msra.mxu0 %v3146_v35  ;;  %v3241_v35 = vld [vmem:[#allocation5 + $0x54] ss:$8 sps:$4 sm:$0xff]  }
  0xba   :  { %1370 = vmatprep.subr.bf16.mxu0 %v3154_v37  ;;  %v3244_v37 = vld [vmem:[#allocation5 + $0x64] ss:$8 sps:$4 sm:$0xff]  }
  0xbb   :  { %1531 = vmatpush1.bf16.msra.mxu1 %v3149_v36  ;;  %v3239_v36 = vld [vmem:[#allocation5 + $0x50] ss:$8 sps:$4 sm:$0xff]  }
  0xbc   :  { %1532 = vmatprep.subr.bf16.mxu1 %v3157_v38  ;;  %v3242_v38 = vld [vmem:[#allocation5 + $0x60] ss:$8 sps:$4 sm:$0xff]  }
  0xbd   :  { %1371 = vmatpush1.bf16.msra.mxu0 %v3152_v39 }
  0xbe   :  { %1372 = vmatprep.subr.bf16.mxu0 %v3160_v41  ;;  %v3245_v41 = vld [vmem:[#allocation5 + $0x70] ss:$8 sps:$4 sm:$0xff]  }
  0xbf   :  { %1533 = vmatpush1.bf16.msra.mxu1 %v3155_v40 }
  0xc0   :  { %1534 = vmatprep.subr.bf16.mxu1 %v3163_v42 }
  0xc1   :  { %1373 = vmatpush1.bf16.msra.mxu0 %v3158_v43  ;;  %v3250_v43 = vld [vmem:[#allocation5 + $0x84] ss:$8 sps:$4 sm:$0xff]  }
  0xc2   :  { %1374 = vmatprep.subr.bf16.mxu0 %v3166_v45  ;;  %v3253_v45 = vld [vmem:[#allocation5 + $0x94] ss:$8 sps:$4 sm:$0xff]  }
  0xc3   :  { %1535 = vmatpush1.bf16.msra.mxu1 %v3161_v44 }
  0xc4   :  { %1536 = vmatprep.subr.bf16.mxu1 %v3169_v46  ;;  %v3251_v46 = vld [vmem:[#allocation5 + $0x90] ss:$8 sps:$4 sm:$0xff]  }
  0xc5   :  { %1375 = vmatpush1.bf16.msra.mxu0 %v3164_v47  ;;  %v3256_v47 = vld [vmem:[#allocation5 + $0xa4] ss:$8 sps:$4 sm:$0xff]  }
  0xc6   :  { %1376 = vmatprep.subr.bf16.mxu0 %v3172_v49  ;;  %v3259_v49 = vld [vmem:[#allocation5 + $0xb4] ss:$8 sps:$4 sm:$0xff]  }
  0xc7   :  { %1537 = vmatpush1.bf16.msra.mxu1 %v3167_v48  ;;  %v3254_v48 = vld [vmem:[#allocation5 + $0xa0] ss:$8 sps:$4 sm:$0xff]  }
  0xc8   :  { %1538 = vmatprep.subr.bf16.mxu1 %v3175_v50  ;;  %v3257_v50 = vld [vmem:[#allocation5 + $0xb0] ss:$8 sps:$4 sm:$0xff]  }
  0xc9   :  { %1377 = vmatpush1.bf16.msra.mxu0 %v3170_v51  ;;  %v3262_v51 = vld [vmem:[#allocation5 + $0xc4] ss:$8 sps:$4 sm:$0xff]  }
  0xca   :  { %1378 = vmatprep.subr.bf16.mxu0 %v3178_v53  ;;  %v3265_v53 = vld [vmem:[#allocation5 + $0xd4] ss:$8 sps:$4 sm:$0xff]  }
  0xcb   :  { %1539 = vmatpush1.bf16.msra.mxu1 %v3173_v52  ;;  %v3260_v52 = vld [vmem:[#allocation5 + $0xc0] ss:$8 sps:$4 sm:$0xff]  }
  0xcc   :  { %1540 = vmatprep.subr.bf16.mxu1 %v3181_v54  ;;  %v3263_v54 = vld [vmem:[#allocation5 + $0xd0] ss:$8 sps:$4 sm:$0xff]  }
  0xcd   :  { %1379 = vmatpush1.bf16.msra.mxu0 %v3176_v55  ;;  %v3268_v55 = vld [vmem:[#allocation5 + $0xe4] ss:$8 sps:$4 sm:$0xff]  }
  0xce   :  { %1380 = vmatprep.subr.bf16.mxu0 %v3184_v57  ;;  %v3271_v57 = vld [vmem:[#allocation5 + $0xf4] ss:$8 sps:$4 sm:$0xff]  }
  0xcf   :  { %1541 = vmatpush1.bf16.msra.mxu1 %v3179_v56  ;;  %v3266_v56 = vld [vmem:[#allocation5 + $0xe0] ss:$8 sps:$4 sm:$0xff]  }
  0xd0   :  { %1542 = vmatprep.subr.bf16.mxu1 %v3187_v58  ;;  %v3269_v58 = vld [vmem:[#allocation5 + $0xf0] ss:$8 sps:$4 sm:$0xff]  }
  0xd1   :  { %1381 = vmatpush1.bf16.msra.mxu0 %v3182_v59  ;;  %v3274_v59 = vld [vmem:[#allocation5 + $0x104] ss:$8 sps:$4 sm:$0xff]  }
  0xd2   :  { %1382 = vmatprep.subr.bf16.mxu0 %v3190_v61  ;;  %v3322_v61 = vld [vmem:[%s3753_s4 + $0x4] ss:$8 sps:$4 sm:$0xff]  }
  0xd3   :  { %1543 = vmatpush1.bf16.msra.mxu1 %v3185_v60  ;;  %v3320_v60 = vld [vmem:[%s3753_s4] ss:$8 sps:$4 sm:$0xff]  }
  0xd4   :  { %1544 = vmatprep.subr.bf16.mxu1 %v3193_v62  ;;  %v3325_v62 = vld [vmem:[%s3753_s4 + $0x14] ss:$8 sps:$4 sm:$0xff]  }
  0xd5   :  { %1383 = vmatpush1.bf16.msra.mxu0 %v3188_v63  ;;  %v3323_v63 = vld [vmem:[%s3753_s4 + $0x10] ss:$8 sps:$4 sm:$0xff]  }
  0xd6   :  { %1384 = vmatprep.subr.bf16.mxu0 %v3196_v2  ;;  %v3326_v2 = vld [vmem:[%s3753_s4 + $0x20] ss:$8 sps:$4 sm:$0xff]  }
  0xd7   :  { %1545 = vmatpush1.bf16.msra.mxu1 %v3191_v1  ;;  %v3328_v1 = vld [vmem:[%s3753_s4 + $0x24] ss:$8 sps:$4 sm:$0xff]  }
  0xd8   :  { %1546 = vmatprep.subr.bf16.mxu1 %v3199_v3  ;;  %v3331_v3 = vld [vmem:[%s3753_s4 + $0x34] ss:$8 sps:$4 sm:$0xff]  }
  0xd9   :  { %1385 = vmatpush1.bf16.msra.mxu0 %v3194_v4  ;;  %v3329_v4 = vld [vmem:[%s3753_s4 + $0x30] ss:$8 sps:$4 sm:$0xff]  }
  0xda   :  { %1386 = vmatprep.subr.bf16.mxu0 %v3202_v6  ;;  %v3332_v6 = vld [vmem:[%s3753_s4 + $0x40] ss:$8 sps:$4 sm:$0xff]  }
  0xdb   :  { %1547 = vmatpush1.bf16.msra.mxu1 %v3197_v5  ;;  %v3334_v5 = vld [vmem:[%s3753_s4 + $0x44] ss:$8 sps:$4 sm:$0xff]  }
  0xdc   :  { %1548 = vmatprep.subr.bf16.mxu1 %v3205_v7  ;;  %v3337_v7 = vld [vmem:[%s3753_s4 + $0x54] ss:$8 sps:$4 sm:$0xff]  }
  0xdd   :  { %1387 = vmatpush1.bf16.msra.mxu0 %v3200_v8  ;;  %v3335_v8 = vld [vmem:[%s3753_s4 + $0x50] ss:$8 sps:$4 sm:$0xff]  }
  0xde   :  { %1388 = vmatprep.subr.bf16.mxu0 %v3208_v11  ;;  %v3338_v11 = vld [vmem:[%s3753_s4 + $0x60] ss:$8 sps:$4 sm:$0xff]  }
  0xdf   :  { %1549 = vmatpush1.bf16.msra.mxu1 %v3203_v9  ;;  %v3340_v9 = vld [vmem:[%s3753_s4 + $0x64] ss:$8 sps:$4 sm:$0xff]  }
  0xe0   :  { %1550 = vmatprep.subr.bf16.mxu1 %v3211_v12  ;;  %v3343_v12 = vld [vmem:[%s3753_s4 + $0x74] ss:$8 sps:$4 sm:$0xff]  }
  0xe1   :  { %1389 = vmatpush1.bf16.msra.mxu0 %v3206_v13  ;;  %v3341_v13 = vld [vmem:[%s3753_s4 + $0x70] ss:$8 sps:$4 sm:$0xff]  }
  0xe2   :  { %1390 = vmatprep.subr.bf16.mxu0 %v3214_v15  ;;  %v3344_v15 = vld [vmem:[%s3753_s4 + $0x80] ss:$8 sps:$4 sm:$0xff]  }
  0xe3   :  { %1551 = vmatpush1.bf16.msra.mxu1 %v3209_v14  ;;  %v3346_v14 = vld [vmem:[%s3753_s4 + $0x84] ss:$8 sps:$4 sm:$0xff]  }
  0xe4   :  { %1552 = vmatprep.subr.bf16.mxu1 %v3217_v16  ;;  %v3349_v16 = vld [vmem:[%s3753_s4 + $0x94] ss:$8 sps:$4 sm:$0xff]  }
  0xe5   :  { %1391 = vmatpush1.bf16.msra.mxu0 %v3212_v17  ;;  %v3347_v17 = vld [vmem:[%s3753_s4 + $0x90] ss:$8 sps:$4 sm:$0xff]  }
  0xe6   :  { %2017 = vmatprep.subr.bf16.mxu0 %v3226_v20  ;;  %v3350_v20 = vld [vmem:[%s3753_s4 + $0xa0] ss:$8 sps:$4 sm:$0xff]  }
  0xe7   :  { %1553 = vmatpush1.bf16.msra.mxu1 %v3215_v19  ;;  %v274_v19 = vlaneseq }
  0xe8   :  { %1554 = vmatprep.subr.bf16.mxu1 %v3220_v21  ;;  %1393 = vmatmul.mubr.bf16.vlgmr.msra.gmra.mrb[0].mxu0 %v67_v22  ;;  %v3355_v21 = vld [vmem:[%s3753_s4 + $0xb4] ss:$8 sps:$4 sm:$0xff]  }
  0xe9   :  { %2018 = vmatpush1.bf16.msra.mxu0 %v3224_v23  ;;  %v3353_v23 = vld [vmem:[%s3753_s4 + $0xb0] ss:$8 sps:$4 sm:$0xff]  }
  0xea   :  { %2019 = vmatprep.subr.bf16.mxu0 %v3229_v25 }
  0xeb   :  { %1555 = vmatpush1.bf16.msra.mxu1 %v3218_v24  ;;  %v3358_v24 = vld [vmem:[%s3753_s4 + $0xc4] ss:$8 sps:$4 sm:$0xff]  }
  0xec   :  { %1565 = vmatprep.subr.bf16.mxu1 %v3223_v26  ;;  %v3650_v26 = vld [vmem:[%s3755_s6] sm:$0xf] }
  0xed   :  { %2020 = vmatpush1.bf16.msra.mxu0 %v3227_v27 }
  0xee   :  { %1557 = vmatmul.mubr.bf16.vlgmr.msra.gmra.mrb[4].mxu1 %v67_v22  ;;  %2021 = vmatprep.subr.bf16.mxu0 %v3232_v29  ;;  %v3636_v22 = vshrl.u32 %v274_v19, 7  ;;  %v3361_v29 = vld [vmem:[%s3753_s4 + $0xd4] ss:$8 sps:$4 sm:$0xff]  }
  0xef   :  { %1566 = vmatpush1.bf16.msra.mxu1 %v3221_v28  ;;  %1597 = vmatprep.mubr.bf16.mxu1 %v3464_v0  ;;  %v3247_v0 = vld [vmem:[#allocation5 + $0x74] ss:$8 sps:$4 sm:$0xff]   ;;  %v3356_v28 = vld [vmem:[%s3753_s4 + $0xc0] ss:$8 sps:$4 sm:$0xff]  }
  0xf0   :  { %2310 = vmatprep.subr.bf16.mxu1 %v3322_v61  ;;  %v3645_v25 = vsub.s32 0, %v3636_v22  ;;  %v3653_v27 = vsub.s32 1, %v3636_v22  ;;  %v3313_v19 = vld [vmem:[#allocation5 + $0x1d4] ss:$8 sps:$4 sm:$0xff]  }
  0xf1   :  { %2022 = vmatpush1.bf16.msra.mxu0 %v3230_v30 }
  0xf2   :  { %2023 = vmatprep.subr.bf16.mxu0 %v3235_v31  ;;  %v277_v30 = vrot.slane %v3650_v26, %v3645_v25  ;;  %v281_v31 = vrot.slane %v3650_v26, %v3653_v27 }
  0xf5   :  { %2024 = vmatpush1.bf16.msra.mxu0 %v3233_v32  ;;  %v3359_v32 = vld [vmem:[%s3753_s4 + $0xd0] ss:$8 sps:$4 sm:$0xff]  }
  0xf6   :  { %2025 = vmatprep.subr.bf16.mxu0 %v3238_v33 }
  0xf9   :  { %2026 = vmatpush1.bf16.msra.mxu0 %v3236_v34 }
  0xfa   :  { %2750 = vmatmul.mubr.msk.bf16.vlgmr.msra.gmra.mrb[4].mxu1 %vm1274_vm0, %v3538_v10  ;;  %2027 = vmatprep.subr.bf16.mxu0 %v3241_v35  ;;  %v3248_v10 = vld [vmem:[#allocation5 + $0x80] ss:$8 sps:$4 sm:$0xff]  }
  0xfb   :  { %2311 = vmatpush1.bf16.msra.mxu1 %v3320_v60  ;;  %v3286_v60 = vld [vmem:[#allocation5 + $0x144] ss:$8 sps:$4 sm:$0xff]  }
  0xfc   :  { %2312 = vmatprep.subr.bf16.mxu1 %v3325_v62 }
  0xfd   :  { %2028 = vmatpush1.bf16.msra.mxu0 %v3239_v36 }
  0xfe   :  { %2029 = vmatprep.subr.bf16.mxu0 %v3244_v37 }
  0xff   :  { %2313 = vmatpush1.bf16.msra.mxu1 %v3323_v63  ;;  %v3284_v63 = vld [vmem:[#allocation5 + $0x140] ss:$8 sps:$4 sm:$0xff]  }
 0x100   :  { %2314 = vmatprep.subr.bf16.mxu1 %v3328_v1  ;;  %v3289_v1 = vld [vmem:[#allocation5 + $0x154] ss:$8 sps:$4 sm:$0xff]  }
 0x101   :  { %v3563_v39 = vpop.f32.mrb[0].mxu1  ;;  %2030 = vmatpush1.bf16.msra.mxu0 %v3242_v38 }
 0x102   :  { %v3565_v40 = vpop.f32.mrb[1].mxu1  ;;  %2031 = vmatprep.subr.bf16.mxu0 %v3247_v0 }
 0x103   :  { %v1439_v42 = vpop.f32.mrb[2].mxu1  ;;  %2315 = vmatpush1.bf16.msra.mxu1 %v3326_v2  ;;  %v3287_v2 = vld [vmem:[#allocation5 + $0x150] ss:$8 sps:$4 sm:$0xff]  }
 0x104   :  { %v1440_v44 = vpop.f32.mrb[3].mxu1  ;;  %2316 = vmatprep.subr.bf16.mxu1 %v3331_v3  ;;  %v3292_v3 = vld [vmem:[#allocation5 + $0x164] ss:$8 sps:$4 sm:$0xff]  }
 0x105   :  { %2032 = vmatpush1.bf16.msra.mxu0 %v3245_v41 }
 0x106   :  { %2033 = vmatprep.subr.bf16.mxu0 %v3250_v43 }
 0x107   :  { %2317 = vmatpush1.bf16.msra.mxu1 %v3329_v4  ;;  %v3290_v4 = vld [vmem:[#allocation5 + $0x160] ss:$8 sps:$4 sm:$0xff]  }
 0x108   :  { %2318 = vmatprep.subr.bf16.mxu1 %v3334_v5  ;;  %v3295_v5 = vld [vmem:[#allocation5 + $0x174] ss:$8 sps:$4 sm:$0xff]  }
 0x109   :  { %2034 = vmatpush1.bf16.msra.mxu0 %v3248_v10 }
 0x10a   :  { %2035 = vmatprep.subr.bf16.mxu0 %v3253_v45 }
 0x10b   :  { %2319 = vmatpush1.bf16.msra.mxu1 %v3332_v6  ;;  %v3293_v6 = vld [vmem:[#allocation5 + $0x170] ss:$8 sps:$4 sm:$0xff]  }
 0x10c   :  { %2320 = vmatprep.subr.bf16.mxu1 %v3337_v7  ;;  %v3298_v7 = vld [vmem:[#allocation5 + $0x184] ss:$8 sps:$4 sm:$0xff]  }
 0x10d   :  { %2036 = vmatpush1.bf16.msra.mxu0 %v3251_v46  ;;  %v3272_v46 = vld [vmem:[#allocation5 + $0x100] ss:$8 sps:$4 sm:$0xff]  }
 0x10e   :  { %2037 = vmatprep.subr.bf16.mxu0 %v3256_v47 }
 0x10f   :  { %2321 = vmatpush1.bf16.msra.mxu1 %v3335_v8  ;;  %v3296_v8 = vld [vmem:[#allocation5 + $0x180] ss:$8 sps:$4 sm:$0xff]  }
 0x110   :  { %2322 = vmatprep.subr.bf16.mxu1 %v3340_v9  ;;  %v3301_v9 = vld [vmem:[#allocation5 + $0x194] ss:$8 sps:$4 sm:$0xff]  }
 0x111   :  { %2038 = vmatpush1.bf16.msra.mxu0 %v3254_v48  ;;  %v3277_v48 = vld [vmem:[#allocation5 + $0x114] ss:$8 sps:$4 sm:$0xff]  }
 0x112   :  { %2039 = vmatprep.subr.bf16.mxu0 %v3259_v49  ;;  %v288_v49 = vsub.s32 3, %v3636_v22 }
 0x113   :  { %2323 = vmatpush1.bf16.msra.mxu1 %v3338_v11  ;;  %v3299_v11 = vld [vmem:[#allocation5 + $0x190] ss:$8 sps:$4 sm:$0xff]  }
 0x114   :  { %2324 = vmatprep.subr.bf16.mxu1 %v3343_v12  ;;  %v3304_v12 = vld [vmem:[#allocation5 + $0x1a4] ss:$8 sps:$4 sm:$0xff]  }
 0x115   :  { %2040 = vmatpush1.bf16.msra.mxu0 %v3257_v50  ;;  %v3280_v50 = vld [vmem:[#allocation5 + $0x124] ss:$8 sps:$4 sm:$0xff]  }
 0x116   :  { %2041 = vmatprep.subr.bf16.mxu0 %v3262_v51 }
 0x117   :  { %2325 = vmatpush1.bf16.msra.mxu1 %v3341_v13  ;;  %v3302_v13 = vld [vmem:[#allocation5 + $0x1a0] ss:$8 sps:$4 sm:$0xff]  }
 0x118   :  { %2326 = vmatprep.subr.bf16.mxu1 %v3346_v14  ;;  %v3307_v14 = vld [vmem:[#allocation5 + $0x1b4] ss:$8 sps:$4 sm:$0xff]  }
 0x119   :  { %2042 = vmatpush1.bf16.msra.mxu0 %v3260_v52  ;;  %v3278_v52 = vld [vmem:[#allocation5 + $0x120] ss:$8 sps:$4 sm:$0xff]  }
 0x11a   :  { %2043 = vmatprep.subr.bf16.mxu0 %v3265_v53 }
 0x11b   :  { %2327 = vmatpush1.bf16.msra.mxu1 %v3344_v15  ;;  %v3305_v15 = vld [vmem:[#allocation5 + $0x1b0] ss:$8 sps:$4 sm:$0xff]  }
 0x11c   :  { %2328 = vmatprep.subr.bf16.mxu1 %v3349_v16  ;;  %v3310_v16 = vld [vmem:[#allocation5 + $0x1c4] ss:$8 sps:$4 sm:$0xff]  }
 0x11d   :  { %2044 = vmatpush1.bf16.msra.mxu0 %v3263_v54  ;;  %v3283_v54 = vld [vmem:[#allocation5 + $0x134] ss:$8 sps:$4 sm:$0xff]  }
 0x11e   :  { %2045 = vmatprep.subr.bf16.mxu0 %v3268_v55 }
 0x11f   :  { %2329 = vmatpush1.bf16.msra.mxu1 %v3347_v17  ;;  %v284_v17 = vsub.s32 2, %v3636_v22 }
 0x120   :  { %2330 = vmatprep.subr.bf16.mxu1 %v3352_v18  ;;  %v3308_v18 = vld [vmem:[#allocation5 + $0x1c0] ss:$8 sps:$4 sm:$0xff]  }
 0x121   :  { %2046 = vmatpush1.bf16.msra.mxu0 %v3266_v56 }
 0x122   :  { %2047 = vmatprep.subr.bf16.mxu0 %v3271_v57 }
 0x123   :  { %2331 = vmatpush1.bf16.msra.mxu1 %v3350_v20  ;;  %v285_v20 = vrot.slane %v3650_v26, %v284_v17 }
 0x124   :  { %2332 = vmatprep.subr.bf16.mxu1 %v3355_v21  ;;  %v3311_v21 = vld [vmem:[#allocation5 + $0x1d0] ss:$8 sps:$4 sm:$0xff]  }
 0x125   :  { %2048 = vmatpush1.bf16.msra.mxu0 %v3269_v58 }
 0x126   :  { %2058 = vmatprep.subr.bf16.mxu0 %v3274_v59  ;;  %v3281_v59 = vld [vmem:[#allocation5 + $0x130] ss:$8 sps:$4 sm:$0xff]  }
 0x127   :  { %2333 = vmatpush1.bf16.msra.mxu1 %v3353_v23  ;;  %v3316_v23 = vld [vmem:[#allocation5 + $0x1e4] ss:$8 sps:$4 sm:$0xff]  }
 0x128   :  { %2334 = vmatprep.subr.bf16.mxu1 %v3358_v24 }
 0x12b   :  { %2335 = vmatpush1.bf16.msra.mxu1 %v3356_v28  ;;  %v3314_v28 = vld [vmem:[#allocation5 + $0x1e0] ss:$8 sps:$4 sm:$0xff]  }
 0x12c   :  { %2336 = vmatprep.subr.bf16.mxu1 %v3361_v29  ;;  %v3319_v29 = vld [vmem:[#allocation5 + $0x1f4] ss:$8 sps:$4 sm:$0xff]  }
 0x12f   :  { %2337 = vmatpush1.bf16.msra.mxu1 %v3359_v32 }
 0x1bb   :  { %v1394_v33 = vpop.f32.mrb[0].mxu0 }
 0x1bc   :  { %v2886_v34 = vadd.f32 %v1394_v33, %v277_v30  ;;  %v1396_v35 = vpop.f32.mrb[1].mxu0  ;;  %v3362_v33 = vld [vmem:[%s3753_s4 + $0xe0] ss:$8 sps:$4 sm:$0xff]  }
 0x1bd   :  { %v2888_v36 = vadd.f32 %v1396_v35, %v281_v31  ;;  %v1398_v37 = vpop.f32.mrb[2].mxu0  ;;  %v3317_v31 = vld [vmem:[#allocation5 + $0x1f0] ss:$8 sps:$4 sm:$0xff]  }
 0x1be   :  { %v2887_v38 = vadd.f32 %v2886_v34, %v3563_v39  ;;  %v1399_v0 = vpop.f32.mrb[3].mxu0  ;;  %v3275_v39 = vld [vmem:[#allocation5 + $0x110] ss:$8 sps:$4 sm:$0xff]   ;;  %v3367_v34 = vld [vmem:[%s3753_s4 + $0xf4] ss:$8 sps:$4 sm:$0xff]  }
 0x1bf   :  { %v2889_v41 = vadd.f32 %v2888_v36, %v3565_v40  ;;  %v289_v40 = vrot.slane %v3650_v26, %v288_v49  ;;  %v3364_v26 = vld [vmem:[%s3753_s4 + $0xe4] ss:$8 sps:$4 sm:$0xff]   ;;  %v3365_v35 = vld [vmem:[%s3753_s4 + $0xf0] ss:$8 sps:$4 sm:$0xff]  }
 0x1c0   :  { %vm1606_vm1 = vcmp.gt.f32.partialorder %v2887_v38, 0.0  ;;  %v1610_v42 = vmul.f32 0.2, %v2887_v38  ;;  %2338 = vmatprep.subr.bf16.mxu1 %v3364_v26  ;;  %v72_v36 = vld [vmem:[%s3755_s6 + $0x4] sm:$0x3] }
 0x1c1   :  { %v1611_v43 = vmul.f32 0.2, %v2889_v41  ;;  %vm1607_vm2 = vcmp.gt.f32.partialorder %v2889_v41, 0.0  ;;  %2339 = vmatpush1.bf16.msra.mxu1 %v3362_v33  ;;  %v1690_v37 = vrot.slane %v72_v36, %v3645_v25 }
 0x1c2   :  { %v1614_v44 = vsel %vm1606_vm1, %v2887_v38, %v1610_v42  ;;  %2340 = vmatprep.subr.bf16.mxu1 %v3367_v34  ;;  %v1694_v38 = vrot.slane %v72_v36, %v3653_v27  ;;  %v2848_v34 = vld [vmem:[%s3755_s6 + $0xa] ss:$0 sm:$0xff] }
 0x1c3   :  { %v1615_v10 = vsel %vm1607_vm2, %v2889_v41, %v1611_v43  ;;  %v1618_v47 = vpack.c.bf16 %v1614_v44, %v1614_v44 }
 0x1c4   :  { %v1619_v45 = vpack.c.bf16 %v1615_v10, %v1615_v10 }
 0x1c5   :  { %2341 = vmatpush1.bf16.msra.mxu1 %v3365_v35 }
 0x1c6   :  { %2049 = vmatprep.mubr.bf16.mxu0 %v1619_v45 }
 0x1c7   :  { %2050 = vmatmul.mubr.bf16.vlgmr.msra.gmra.mrb[4].mxu0 %v1618_v47 }
 0x1c8   :  { %2059 = vmatpush1.bf16.msra.mxu0 %v3272_v46 }
 0x1c9   :  { %2060 = vmatprep.subr.bf16.mxu0 %v3277_v48 }
 0x1cc   :  { %2061 = vmatpush1.bf16.msra.mxu0 %v3275_v39 }
 0x1cd   :  { %v1599_v51 = vpop.f32.mrb[4].mxu1  ;;  %2062 = vmatprep.subr.bf16.mxu0 %v3280_v50  ;;  %v3368_v50 = vld [vmem:[%s3754_s5] sm:$0xff]  }
 0x1ce   :  { %v1601_v53 = vpop.f32.mrb[5].mxu1  ;;  %v2890_v24 = vadd.f32 %v1599_v51, %v285_v20  ;;  %v3369_v51 = vld [vmem:[%s3754_s5 + $0x8] sm:$0xff]  }
 0x1cf   :  { %v2891_v55 = vadd.f32 %v1601_v53, %v289_v40  ;;  %v1603_v56 = vpop.f32.mrb[6].mxu1  ;;  %v3465_v40 = vmov 0.0   ;;  %v3371_v53 = vld [vmem:[%s3754_s5 + $0x18] sm:$0xff]  }
 0x1d0   :  { %v1604_v57 = vpop.f32.mrb[7].mxu1  ;;  %2063 = vmatpush1.bf16.msra.mxu0 %v3278_v52  ;;  %v1612_v30 = vmul.f32 0.2, %v2890_v24  ;;  %vm1608_vm4 = vcmp.gt.f32.partialorder %v2890_v24, 0.0  ;;  %2866 = vmatprep.subr.bf16.mxu1 %v3465_v40  ;;  %v3370_v52 = vld [vmem:[%s3754_s5 + $0x10] sm:$0xff]  }
 0x1d1   :  { %vm1609_vm3 = vcmp.gt.f32.partialorder %v2891_v55, 0.0  ;;  %v1613_v58 = vmul.f32 0.2, %v2891_v55  ;;  %2064 = vmatprep.subr.bf16.mxu0 %v3283_v54  ;;  %v3372_v54 = vld [vmem:[%s3754_s5 + $0x20] sm:$0xff]   ;;  %v3374_v56 = vld [vmem:[%s3754_s5 + $0x30] sm:$0xff]   ;;  %v3375_v57 = vld [vmem:[%s3754_s5 + $0x38] sm:$0xff]  }
 0x1d2   :  { %v1616_v22 = vsel %vm1608_vm4, %v2890_v24, %v1612_v30 }
 0x1d3   :  { %v1617_v61 = vsel %vm1609_vm3, %v2891_v55, %v1613_v58  ;;  %v1620_v32 = vpack.c.bf16 %v1616_v22, %v1616_v22  ;;  %v3373_v55 = vld [vmem:[%s3754_s5 + $0x28] sm:$0xff]   ;;  %v70_v58 = vld [vmem:[%s3750_s1] sm:$0xff] }
 0x1d4   :  { %v1621_v62 = vpack.c.bf16 %v1617_v61, %v1617_v61  ;;  %2065 = vmatpush1.bf16.msra.mxu0 %v3281_v59  ;;  %v2516_v59 = vmul.f32 0.01, %v70_v58  ;;  %v2847_v22 = vld [vmem:[%s3755_s6 + $0x9] ss:$0 sm:$0xff] }
 0x1d5   :  { %2066 = vmatprep.subr.bf16.mxu0 %v3286_v60  ;;  %v3721_v60 = vld [vmem:[%s3755_s6 + $0x6] sm:$0x3] }
 0x1d6   :  { %2090 = vmatprep.mubr.bf16.mxu0 %v1621_v62  ;;  %2518 = vrot.lane.b32.xlu1 %v2516_v59, %s3467_s24  ;;  %v2143_v61 = vrot.slane %v3721_v60, %v3645_v25 }
 0x1d8   :  { %2067 = vmatpush1.bf16.msra.mxu0 %v3284_v63 }
 0x1d9   :  { %2068 = vmatprep.subr.bf16.mxu0 %v3289_v1 }
 0x1dc   :  { %2069 = vmatpush1.bf16.msra.mxu0 %v3287_v2 }
 0x1dd   :  { %2070 = vmatprep.subr.bf16.mxu0 %v3292_v3 }
 0x1e0   :  { %2071 = vmatpush1.bf16.msra.mxu0 %v3290_v4 }
 0x1e1   :  { %2072 = vmatprep.subr.bf16.mxu0 %v3295_v5 }
 0x1e4   :  { %2073 = vmatpush1.bf16.msra.mxu0 %v3293_v6 }
 0x1e5   :  { %2074 = vmatprep.subr.bf16.mxu0 %v3298_v7 }
 0x1e8   :  { %2075 = vmatpush1.bf16.msra.mxu0 %v3296_v8 }
 0x1e9   :  { %2076 = vmatprep.subr.bf16.mxu0 %v3301_v9 }
 0x1ec   :  { %2077 = vmatpush1.bf16.msra.mxu0 %v3299_v11 }
 0x1ed   :  { %2078 = vmatprep.subr.bf16.mxu0 %v3304_v12 }
 0x1f0   :  { %2079 = vmatpush1.bf16.msra.mxu0 %v3302_v13 }
 0x1f1   :  { %2080 = vmatprep.subr.bf16.mxu0 %v3307_v14 }
 0x1f4   :  { %2081 = vmatpush1.bf16.msra.mxu0 %v3305_v15 }
 0x1f5   :  { %2082 = vmatprep.subr.bf16.mxu0 %v3310_v16 }
 0x1f8   :  { %2083 = vmatpush1.bf16.msra.mxu0 %v3308_v18 }
 0x1f9   :  { %2084 = vmatprep.subr.bf16.mxu0 %v3313_v19 }
 0x1fc   :  { %2085 = vmatpush1.bf16.msra.mxu0 %v3311_v21 }
 0x1fd   :  { %2086 = vmatprep.subr.bf16.mxu0 %v3316_v23 }
 0x200   :  { %2087 = vmatpush1.bf16.msra.mxu0 %v3314_v28  ;;  %v74_v28 = vld [vmem:[%s3755_s6 + $0x8] sm:$0x1]  ;;  %s3469_s6 = smov [#allocation7]  }
 0x201   :  { %2088 = vmatprep.subr.bf16.mxu0 %v3319_v29  ;;  %s2543_s30 = sshll.u32 %s3469_s6, 4  ;;  %s2544_s30 = int_to_ptr.vmem [resolvable:$true] %s2543_s30 }
 0x202   :  { %s3430_s4 = scalar_lea.vmem %s2544_s30, 128  ;;  %p3435_p3 = scmp.lt.s32.totalorder %s2544_s30, %s2544_s30 }
 0x203   :  { %p3431_p2 = scmp.ne.s32.totalorder %s2544_s30, %s3430_s4  ;;  %p3436_p4 = scmp.lt.s32.totalorder %s3430_s4, %s3430_s4 }
 0x204   :  { %2089 = vmatpush1.bf16.msra.mxu0 %v3317_v31 }
 0x205   :  { %p3437_p5 = por %p3436_p4, %p3435_p3 }
 0x207   :  { %2091 = vmatmul.mubr.bf16.vlgmr.msra.gmra.mrb[4].mxu0 %v1620_v32  ;;  %p3438_p6 = pnand %p3437_p5, %p3431_p2 }
 0x2da   :  { %v2092_v0 = vpop.f32.mrb[4].mxu0 }
 0x2db   :  { %v2892_v41 = vadd.f32 %v2092_v0, %v1690_v37  ;;  %v2094_v42 = vpop.f32.mrb[5].mxu0 }
 0x2dc   :  { %v2893_v43 = vadd.f32 %v2094_v42, %v1694_v38  ;;  %v2096_v44 = vpop.f32.mrb[6].mxu0 }
 0x2dd   :  { %vm2099_vm5 = vcmp.gt.f32.partialorder %v2892_v41, 0.0  ;;  %v2101_v10 = vmul.f32 0.2, %v2892_v41  ;;  %v2097_v45 = vpop.f32.mrb[7].mxu0 }
 0x2de   :  { %vm2100_vm6 = vcmp.gt.f32.partialorder %v2893_v43, 0.0  ;;  %v2102_v46 = vmul.f32 0.2, %v2893_v43  ;;  %v2519_v45 = vpop.permute.xlu1 %2518 }
 0x2df   :  { %v2103_v47 = vsel %vm2099_vm5, %v2892_v41, %v2101_v10 }
 0x2e0   :  { %v2104_v48 = vsel %vm2100_vm6, %v2893_v43, %v2102_v46  ;;  %v2105_v39 = vpack.c.bf16 %v2103_v47, %v2103_v47 }
 0x2e1   :  { %v2106_v49 = vpack.c.bf16 %v2104_v48, %v2104_v48 }
 0x2e3   :  { %2342 = vmatprep.mubr.bf16.mxu1 %v2106_v49 }
 0x2e4   :  { %2343 = vmatmul.mubr.bf16.vlgmr.msra.gmra.mrb[8].mxu1 %v2105_v39  ;;  %v2147_v39 = vrot.slane %v3721_v60, %v3653_v27 }
 0x2e5   :  { %2867 = vmatpush3.bf16.msra.mxu1 %v3368_v50  ;;  %2882 = vmatprep.mubr.msk.bf16.mxu1 %vm3466_vm7, %v3465_v40 }
 0x2e6   :  { %2868 = vmatprep.subr.bf16.mxu1 %v3465_v40 }
 0x2e9   :  { %2869 = vmatpush3.bf16.msra.mxu1 %v3369_v51 }
 0x2ea   :  { %2870 = vmatprep.subr.bf16.mxu1 %v3465_v40 }
 0x2ed   :  { %2871 = vmatpush3.bf16.msra.mxu1 %v3370_v52 }
 0x2ee   :  { %2872 = vmatprep.subr.bf16.mxu1 %v3465_v40 }
 0x2f1   :  { %2873 = vmatpush3.bf16.msra.mxu1 %v3371_v53 }
 0x2f2   :  { %2874 = vmatprep.subr.bf16.mxu1 %v3465_v40 }
 0x2f5   :  { %2875 = vmatpush3.bf16.msra.mxu1 %v3372_v54 }
 0x2f6   :  { %2876 = vmatprep.subr.bf16.mxu1 %v3465_v40 }
 0x2f9   :  { %2877 = vmatpush3.bf16.msra.mxu1 %v3373_v55 }
 0x2fa   :  { %2878 = vmatprep.subr.bf16.mxu1 %v3465_v40 }
 0x2fd   :  { %2879 = vmatpush3.bf16.msra.mxu1 %v3374_v56 }
 0x2fe   :  { %2880 = vmatprep.subr.bf16.mxu1 %v3465_v40 }
 0x301   :  { %2881 = vmatpush3.bf16.msra.mxu1 %v3375_v57 }
 0x3b7   :  { %v2344_v62 = vpop.f32.mrb[8].mxu1 }
 0x3b8   :  { %v2345_v63 = vadd.f32 %v2344_v62, %v2143_v61  ;;  %v2346_v1 = vpop.f32.mrb[9].mxu1 }
 0x3b9   :  { %v2348_v2 = vpop.f32.mrb[10].mxu1  ;;  %v2347_v50 = vadd.f32 %v2346_v1, %v2147_v39 }
 0x3ba   :  { %vm2356_vm8 = vcmp.gt.f32.partialorder %v2345_v63, 0.0  ;;  %v2357_v3 = vmul.f32 0.01, %v2345_v63  ;;  %v2349_v4 = vpop.f32.mrb[11].mxu1 }
 0x3bb   :  { %v2351_v40 = vsub.f32 0.0, %v2347_v50 }
 0x3bc   :  { %v2358_v5 = vsel %vm2356_vm8, %v2345_v63, %v2357_v3 }
 0x3bd   :  { %v2359_v6 = vrot.slane %v2358_v5, 4  ;;  %v2352_v51 = vmul.f32 1.442695, %v2351_v40 }
 0x3bf   :  { %v2360_v7 = vadd.f32 %v2359_v6, %v2358_v5 }
 0x3c1   :  { %v2361_v8 = vrot.slane %v2360_v7, 2 }
 0x3c3   :  { %v2362_v9 = vadd.f32 %v2361_v8, %v2360_v7 }
 0x3c5   :  { %v2363_v11 = vrot.slane %v2362_v9, 1 }
 0x3c7   :  { %v2364_v12 = vadd.f32 %v2363_v11, %v2362_v9 }
 0x3c9   :  { %v2366_v13 = vmul.f32 0.125, %v2364_v12 }
 0x3cb   :  { %v2367_v14 = vsub.f32 %v2358_v5, %v2366_v13 }
 0x3cd   :  { %v2368_v15 = vmul.f32 %v2367_v14, %v2367_v14 }
 0x3cf   :  { %v2369_v16 = vrot.slane %v2368_v15, 4 }
 0x3d1   :  { %v2370_v17 = vadd.f32 %v2369_v16, %v2368_v15 }
 0x3d3   :  { %v2371_v18 = vrot.slane %v2370_v17, 2 }
 0x3d5   :  { %v2372_v19 = vadd.f32 %v2371_v18, %v2370_v17 }
 0x3d7   :  { %v2373_v20 = vrot.slane %v2372_v19, 1 }
 0x3d9   :  { %v2374_v21 = vadd.f32 %v2373_v20, %v2372_v19 }
 0x3db   :  { %v2375_v23 = vmul.f32 0.125, %v2374_v21 }
 0x3dd   :  { %v2376_v24 = vadd.f32 1e-05, %v2375_v23 }
 0x3df   :  { %3376 = vrsqrt.f32 %v2376_v24 }
 0x3e9   :  { %v3377_v29 = vpop.eup %3376 }
 0x3ea   :  { %v2378_v30 = vmul.f32 %v3377_v29, %v74_v28 }
 0x3ec   :  { %v2383_v31 = vrot.slane %v2378_v30, %v3645_v25 }
 0x3ee   :  { %v2385_v32 = vmul.f32 %v2383_v31, %v2367_v14 }
 0x3f0   :  { %v2392_v26 = vadd.f32 %v2847_v22, %v2385_v32 }
 0x3f2   :  { %v2393_v33 = vpack.c.bf16 %v2392_v26, %v2392_v26 }
 0x3f4   :  { %2883 = vmatmul.mubr.bf16.vlgmr.msra.gmra.mrb[12].mxu1 %v2393_v33 }
 0x4c7   :  { %v2498_v35 = vpop.f32.mrb[12].mxu1 }
 0x4c8   :  { %v2499_v36 = vadd.f32 %v2848_v34, %v2498_v35  ;;  %v2884_v37 = vpop.f32.mrb[13].mxu1 }
 0x4c9   :  { %v2501_v38 = vpop.f32.mrb[14].mxu1 }
 0x4ca   :  { %v2885_v0 = vpop.f32.mrb[15].mxu1  ;;  %v2505_v41 = vsel %vm2504_vm9, %v2499_v36, -inf  ;;  %v2521_v46 = vadd.f32 %v2519_v45, %v2499_v36 }
 0x4cb   :  { %2506 = vmax.xlane.f32.xlu0 %v2505_v41 }
 0x558   :  { %v2507_v25 = vpop.xlane.xlu0 %2506 }
 0x559   :  { %v2508_v42 = vsub.f32 %v2499_v36, %v2507_v25 }
 0x55b   :  { %v2509_v43 = vmul.f32 1.442695, %v2508_v42 }
 0x55d   :  { %3378 = vpow2.f32 %v2509_v43 }
 0x567   :  { %v3379_v44 = vpop.eup %3378 }
 0x568   :  { %v2511_v10 = vsel %vm2504_vm9, %v3379_v44, 0.0 }
 0x569   :  { %2512 = vadd.xlane.f32.xlu0 %v2511_v10 }
 0x57f   :  { %2527 = vrot.lane.b32.xlu0 %v2521_v46, %s3468_s29 }
 0x5f6   :  { %v2513_v47 = vpop.xlane.xlu0 %2512 }
 0x5f7   :  { %3380 = vrcp.f32 %v2513_v47 }
 0x5f8   :  { %3382 = vpow2.f32 %v2352_v51 }
 0x5fa   :  { %v2528_v56 = vpop.permute.xlu0 %2527 }
 0x601   :  { %v3381_v48 = vpop.eup %3380 }
 0x602   :  { %v2515_v49 = vmul.f32 %v3381_v48, %v3379_v44  ;;  %v3383_v52 = vpop.eup %3382 }
 0x603   :  { %v2354_v53 = vadd.f32 1.0, %v3383_v52 }
 0x604   :  { %2523 = vrot.lane.b32.xlu1 %v2515_v49, %s3468_s29 }
 0x605   :  { %3384 = vrcp.f32 %v2354_v53 }
 0x60f   :  { %v3385_v54 = vpop.eup %3384 }
 0x676   :  { %v2524_v55 = vpop.permute.xlu1 %2523 }
 0x677   :  { %v2531_v57 = vsel %vm2530_vm10, %v3385_v54, %v2524_v55 }
 0x678   :  { %v2533_v58 = vsel %vm2532_vm11, %v2531_v57, %v2528_v56 }
 0x679   :  { %v2535_v59 = vsel %vm2534_vm12, %v2533_v58, 0.0 }
 0x67a   :  { %2536 = vst [vmem:[#allocation7] sm:$0xff] %v2535_v59 }
 0x67b   :  { %3441 = shalt.err (!%p3438_p6)
}
 0x67c   :  { %s3442_s10 = scalar_lea.hbm %s3756_s7, 128 }
 0x67d   :  { %p3443_p7 = scmp.ne.s32.totalorder %s3756_s7, %s3442_s10  ;;  %p3446_p8 = scmp.lt.u32.totalorder %s3442_s10, %s3756_s7 }
 0x67f   :  { %p3448_p9 = pnand %p3446_p8, %p3443_p7 }
 0x681   :  { %3451 = shalt.err (!%p3448_p9)
}
 0x682   :  { %2546 = dma.vmem_to_hbm [thread:$0]  %s2544_s30, 128, %s3756_s7, [#allocation4]  }
 0x683   :  { %3456 = dma.done.wait [#allocation4], 128  }
 0x684   :  { %3457 = vsyncadd [#allocation4], 4294967168 }
 0x685   :  { %2550 = vsyncpa [#allocation3], 1 }
 0x686   :  { %2551 = vsyncpa [#allocation6], 1 }
 0x687   :  { %2552 = vsyncpa [#allocation4], 1 }

</bundles_post_ra>
